<compile_context>
chip_gen: v5e
topology: v5e:2x2
jax: 0.10.0
libtpu: 0.0.40
codegen_flags: <defaults>
</compile_context>

<pallas_src>
import functools

import jax
import jax.numpy as jnp
from jax.experimental import pallas as pl
from jax.experimental.pallas import tpu as pltpu


# For ConvTranspose(k=4, s=2, p=3): output row oy = 2*m + py uses, per phase
# py, exactly two kernel taps (ky) with input row iy = m + offset:
#   py=0 -> (offset=0, ky=3), (offset=1, ky=1)
#   py=1 -> (offset=1, ky=2), (offset=2, ky=0)
# (same along x).  No boundary clipping is needed for this (k, s, p) combo.
_PHASE_TAPS = (((0, 3), (1, 1)),
               ((1, 2), (2, 0)))
# 9 distinct (dy, dx) input offsets used across the 4 phases.
_SLAB_OFFSETS = tuple((a, b) for a in range(3) for b in range(3))


# ----------------------------------------------------------------------------
# Fused Pallas kernel (one grid step == a tile of B samples on lanes)
# ----------------------------------------------------------------------------

def _fused_unet_kernel(dp_ref, nrm_ref, seg_ref, segt_ref,
                       wd_ref, bd_ref, wdi_ref, bdi_ref, wui_ref, bui_ref,
                       wup_ref, bup_ref, o_ref, mid_ref, *,
                       ngf, ngf2, wo, hw, bhw):
    eps = 1e-5
    inv_hw = 1.0 / hw
    seg = seg_ref[...]                     # (bhw, B)  segment-sum matrix
    segt = segt_ref[...]                   # (B, bhw)  segment-broadcast matrix

    def cin(v, gamma, beta):
        """Class-conditional instance norm over each sample's hw-lane segment
        (per-sample stats via tiny segment matmuls; MXU has slack here)."""
        mu = jnp.dot(v, seg, preferred_element_type=jnp.float32) * inv_hw
        ex2 = jnp.dot(v * v, seg, preferred_element_type=jnp.float32) * inv_hw
        a = jax.lax.rsqrt(ex2 - mu * mu + eps) * gamma          # (C, B)
        c = beta - mu * a                                       # (C, B)
        return (v * jnp.dot(a, segt, preferred_element_type=jnp.float32)
                + jnp.dot(c, segt, preferred_element_type=jnp.float32))

    patches = dp_ref[0]                                          # (Cin*16, bhw)

    # ---- outermost down: SN-Conv2d(Cin, ngf, 4, s=2, p=3) + ReLU
    h = jnp.dot(wd_ref[...], patches, preferred_element_type=jnp.float32)
    h = jnp.maximum(h + bd_ref[...], 0.0)                        # (ngf, bhw)

    # per-sample class-conditional norm params: resident table, one row/step
    nrm = nrm_ref[pl.program_id(0)]                              # (pn, B)
    g_d = nrm[0:ngf2]
    b_d = nrm[ngf2:2 * ngf2]
    g_u = nrm[2 * ngf2:2 * ngf2 + ngf]
    b_u = nrm[2 * ngf2 + ngf:2 * ngf2 + 2 * ngf]

    # ---- innermost down: SN-Conv2d(ngf, ngf2, 1) + class-cond IN + ReLU
    t = jnp.dot(wdi_ref[...], h, preferred_element_type=jnp.float32) + bdi_ref[...]
    t = jnp.maximum(cin(t, g_d, b_d), 0.0)                       # (ngf2, bhw)

    # ---- innermost up: SN-ConvTranspose2d(ngf2, ngf, 1) + class-cond IN + ReLU
    u = jnp.dot(wui_ref[...], t, preferred_element_type=jnp.float32) + bui_ref[...]
    u = jnp.maximum(cin(u, g_u, b_u), 0.0)                       # (ngf, bhw)

    # ---- torch.cat((x, x_), 1): channels are sublanes -> write h / u into the
    # persistent mid scratch; zero the small lane tail that slab reads can
    # spill into (only junk output positions ever read it).
    mid_ref[0:ngf, 0:bhw] = h
    mid_ref[ngf:2 * ngf, 0:bhw] = u
    pad_w = mid_ref.shape[1] - bhw
    mid_ref[:, bhw:] = jnp.zeros((2 * ngf, pad_w), jnp.float32)

    # ---- outermost up: SN-ConvTranspose2d(2*ngf, Cout, 4, s=2, p=3) + tanh as
    # ONE merged matmul: stack the 9 distinct offset slabs of mid on sublanes,
    # multiply by the wrapper-packed (4*Cout, 9*2*ngf) phase weight, and do a
    # single lane-dense store of all 4 output phases.
    slabs = [mid_ref[:, a * wo + b: a * wo + b + bhw]
             for (a, b) in _SLAB_OFFSETS]
    big = jnp.concatenate(slabs, axis=0)                         # (9*2*ngf, bhw)
    acc = jnp.dot(wup_ref[...], big, preferred_element_type=jnp.float32)
    o_ref[0] = jnp.tanh(acc + bup_ref[...]).astype(o_ref.dtype)


# ----------------------------------------------------------------------------
# Plain-JAX glue: spectral norm (weight reparam), im2col, phase-weight packing
# ----------------------------------------------------------------------------

def spectral_normalize(w, dim=0, n_iter=5, eps=1e-12):
    """PyTorch-style spectral_norm: divide weight by its top singular value of
    the weight reshaped with `dim` first (dim=1 for ConvTranspose)."""
    if dim != 0:
        perm = (dim,) + tuple(i for i in range(w.ndim) if i != dim)
        w_mat = jnp.transpose(w, perm).reshape(w.shape[dim], -1)
    else:
        w_mat = w.reshape(w.shape[0], -1)
    u = jnp.ones((w_mat.shape[0],), w.dtype) / jnp.sqrt(
        jnp.asarray(w_mat.shape[0], w.dtype))
    v = None
    for _ in range(n_iter):
        v = w_mat.T @ u
        v = v / (jnp.linalg.norm(v) + eps)
        u = w_mat @ v
        u = u / (jnp.linalg.norm(u) + eps)
    sigma = u @ (w_mat @ v)
    return w / sigma


def im2col_cmajor(x_nchw, k, stride, pad):
    """Patches for a k x k conv, channel-major-K, spatial-on-lanes layout:
    (N, C*k*k, Hout*Wout), K ordering (c, ky, kx) matching
    torch weight.reshape(Cout, Cin*k*k)."""
    N, C, H, W = x_nchw.shape
    xp = jnp.pad(x_nchw, ((0, 0), (0, 0), (pad, pad), (pad, pad)))
    Hout = (H + 2 * pad - k) // stride + 1
    Wout = (W + 2 * pad - k) // stride + 1
    cols = []
    for a in range(k):
        for b in range(k):
            cols.append(xp[:, :, a:a + stride * Hout:stride,
                           b:b + stride * Wout:stride])          # (N, C, Ho, Wo)
    p = jnp.stack(cols, axis=2)                                  # (N, C, k*k, Ho, Wo)
    return p.reshape(N, C * k * k, Hout * Wout), Hout, Wout


def _build_merged_up_weight(w):
    """w: ConvTranspose weight (2*ngf, Cout, 4, 4) -> (4*Cout, 9*2*ngf): all 4
    output phases packed on rows, the 9 (dy, dx) offset slabs on columns (zeros
    where a phase does not use that offset)."""
    c_in2, cout = w.shape[0], w.shape[1]
    rows = []
    for py in range(2):
        tap_y = dict(_PHASE_TAPS[py])                 # offset a -> ky
        for px in range(2):
            tap_x = dict(_PHASE_TAPS[px])             # offset b -> kx
            cols = []
            for (a, b) in _SLAB_OFFSETS:
                if a in tap_y and b in tap_x:
                    cols.append(w[:, :, tap_y[a], tap_x[b]])      # (2*ngf, Cout)
                else:
                    cols.append(jnp.zeros((c_in2, cout), w.dtype))
            rows.append(jnp.concatenate(cols, axis=0).T)          # (Cout, 9*2*ngf)
    return jnp.concatenate(rows, axis=0)                          # (4*Cout, 9*2*ngf)


def _pick_samples_per_step(n):
    """8-32 samples per grid step to amortize fixed per-step cost, but always
    keep >=2 grid steps when possible so both v7x TensorCores get work."""
    for b in (32, 16, 8, 4, 2):
        if n >= 2 * b:
            return b
    return 1


# ----------------------------------------------------------------------------
# Parameters + forward
# ----------------------------------------------------------------------------

def init_params(key, cin, ngf, ngf2, ncls):
    ks = jax.random.split(key, 12)
    s = 0.2
    p = {}
    # outermost: Conv2d(cin, ngf, 4, p=3, s=2) / ConvT(2*ngf, cin, 4, p=3, s=2)
    p["down_o_w"] = spectral_normalize(s * jax.random.normal(ks[0], (ngf, cin, 4, 4)), dim=0)
    p["down_o_b"] = 0.1 * jax.random.normal(ks[1], (ngf,))
    p["up_o_w"] = spectral_normalize(s * jax.random.normal(ks[2], (2 * ngf, cin, 4, 4)), dim=1)
    p["up_o_b"] = 0.1 * jax.random.normal(ks[3], (cin,))
    # innermost: Conv2d(ngf, ngf2, 1) / ConvT(ngf2, ngf, 1)
    p["down_i_w"] = spectral_normalize(s * jax.random.normal(ks[4], (ngf2, ngf, 1, 1)), dim=0)
    p["down_i_b"] = 0.1 * jax.random.normal(ks[5], (ngf2,))
    p["up_i_w"] = spectral_normalize(s * jax.random.normal(ks[6], (ngf2, ngf, 1, 1)), dim=1)
    p["up_i_b"] = 0.1 * jax.random.normal(ks[7], (ngf,))
    # class-conditional instance-norm embeddings (norm_layer(channels, ncls))
    p["gamma_d"] = 1.0 + 0.1 * jax.random.normal(ks[8], (ncls, ngf2))
    p["beta_d"] = 0.1 * jax.random.normal(ks[9], (ncls, ngf2))
    p["gamma_u"] = 1.0 + 0.1 * jax.random.normal(ks[10], (ncls, ngf))
    p["beta_u"] = 0.1 * jax.random.normal(ks[11], (ncls, ngf))
    return p


def unet_forward(x, y, p):
    """x: (N, Cin, H, W) NCHW f32, y: (N,) int class labels -> (N, Cin, H, W)."""
    N, Cin, H, W = x.shape
    ngf = p["down_o_w"].shape[0]
    ngf2 = p["down_i_w"].shape[0]
    cout = p["up_o_w"].shape[1]

    # im2col for the 4x4 down conv: (N, Cin*16, Ho*Wo), spatial on lanes
    patches, ho, wo = im2col_cmajor(x, 4, 2, 3)
    hw = ho * wo
    kd = Cin * 16
    hp, wp = ho - 2, wo - 2            # valid phase grid (14 x 14 for MNIST)

    # batch tiling: B samples folded onto lanes per grid step
    B = _pick_samples_per_step(N)
    G = -(-N // B)
    n_pad = G * B
    yp = y
    if n_pad != N:
        patches = jnp.concatenate(
            [patches, jnp.zeros((n_pad - N,) + patches.shape[1:], patches.dtype)], 0)
        yp = jnp.concatenate([y, jnp.zeros((n_pad - N,), y.dtype)], 0)
    bhw = B * hw
    patches = patches.astype(jnp.float32).reshape(G, B, kd, hw)
    patches = patches.transpose(0, 2, 1, 3).reshape(G, kd, bhw)   # (G, kd, B*hw)

    # per-sample class-conditional norm params, packed channel-on-sublane,
    # sample-on-lane; passed as a RESIDENT table (one DMA total)
    nrm = jnp.concatenate(
        [p["gamma_d"][yp], p["beta_d"][yp], p["gamma_u"][yp], p["beta_u"][yp]],
        axis=1).astype(jnp.float32)                               # (n_pad, pn)
    pn = nrm.shape[1]
    nrm = nrm.reshape(G, B, pn).transpose(0, 2, 1)                # (G, pn, B)

    # segment-sum / segment-broadcast matrices for the per-sample instance norms
    seg = (jnp.arange(bhw)[:, None] // hw ==
           jnp.arange(B)[None, :]).astype(jnp.float32)            # (bhw, B)
    segt = seg.T                                                  # (B, bhw)

    wd = p["down_o_w"].reshape(ngf, kd).astype(jnp.float32)
    bd = p["down_o_b"].reshape(ngf, 1).astype(jnp.float32)
    wdi = p["down_i_w"].reshape(ngf2, ngf).astype(jnp.float32)
    bdi = p["down_i_b"].reshape(ngf2, 1).astype(jnp.float32)
    wui = p["up_i_w"].reshape(ngf2, ngf).T.astype(jnp.float32)    # (ngf, ngf2)
    bui = p["up_i_b"].reshape(ngf, 1).astype(jnp.float32)
    wup = _build_merged_up_weight(p["up_o_w"]).astype(jnp.float32)  # (4*cout, 9*2*ngf)
    bup = jnp.tile(p["up_o_b"], 4).reshape(4 * cout, 1).astype(jnp.float32)

    kernel = functools.partial(_fused_unet_kernel, ngf=ngf, ngf2=ngf2,
                               wo=wo, hw=hw, bhw=bhw)
    out_ph = pl.pallas_call(
        kernel,
        out_shape=jax.ShapeDtypeStruct((G, 4 * cout, bhw), jnp.float32),
        grid=(G,),
        in_specs=[
            pl.BlockSpec((1, kd, bhw), lambda g: (g, 0, 0)),           # patches
            pl.BlockSpec((G, pn, B), lambda g: (0, 0, 0)),             # norm table (resident)
            pl.BlockSpec((bhw, B), lambda g: (0, 0)),                  # seg (resident)
            pl.BlockSpec((B, bhw), lambda g: (0, 0)),                  # segt (resident)
            pl.BlockSpec((ngf, kd), lambda g: (0, 0)),                 # wd
            pl.BlockSpec((ngf, 1), lambda g: (0, 0)),                  # bd
            pl.BlockSpec((ngf2, ngf), lambda g: (0, 0)),               # wdi
            pl.BlockSpec((ngf2, 1), lambda g: (0, 0)),                 # bdi
            pl.BlockSpec((ngf, ngf2), lambda g: (0, 0)),               # wui
            pl.BlockSpec((ngf, 1), lambda g: (0, 0)),                  # bui
            pl.BlockSpec((4 * cout, 9 * 2 * ngf), lambda g: (0, 0)),   # wup merged
            pl.BlockSpec((4 * cout, 1), lambda g: (0, 0)),             # bup tiled
        ],
        out_specs=pl.BlockSpec((1, 4 * cout, bhw), lambda g: (g, 0, 0)),
        scratch_shapes=[pltpu.VMEM((2 * ngf, bhw + 128), jnp.float32)],
        compiler_params=pltpu.CompilerParams(
            dimension_semantics=("parallel",)),
    )(patches, nrm, seg, segt, wd, bd, wdi, bdi, wui, bui, wup, bup)

    # de-interleave the 4 output phases back to NCHW (layout plumbing only)
    op = out_ph.reshape(G, 2, 2, cout, B, ho, wo)[..., :hp, :wp]
    out = op.transpose(0, 4, 3, 5, 1, 6, 2).reshape(G * B, cout, 2 * hp, 2 * wp)
    return out[:N]


# ----------------------------------------------------------------------------
# Pure-JAX reference (correctness check)
# ----------------------------------------------------------------------------

def ref_forward(x, y, p):
    hi = jax.lax.conv_general_dilated(
        x, p["down_o_w"], window_strides=(2, 2), padding=[(3, 3), (3, 3)],
        dimension_numbers=("NCHW", "OIHW", "NCHW"),
        precision=jax.lax.Precision.HIGHEST)
    h = jnp.maximum(hi + p["down_o_b"][None, :, None, None], 0.0)

    def cin(v, gamma, beta):
        mu = jnp.mean(v, axis=(2, 3), keepdims=True)
        var = jnp.mean(jnp.square(v - mu), axis=(2, 3), keepdims=True)
        return ((v - mu) * jax.lax.rsqrt(var + 1e-5)
                * gamma[:, :, None, None] + beta[:, :, None, None])

    ngf2, ngf = p["down_i_w"].shape[0], p["down_i_w"].shape[1]
    t = jnp.einsum("oi,nihw->nohw", p["down_i_w"].reshape(ngf2, ngf), h,
                   precision=jax.lax.Precision.HIGHEST)
    t = jnp.maximum(cin(t + p["down_i_b"][None, :, None, None],
                        p["gamma_d"][y], p["beta_d"][y]), 0.0)
    u = jnp.einsum("io,nihw->nohw", p["up_i_w"].reshape(ngf2, ngf), t,
                   precision=jax.lax.Precision.HIGHEST)
    u = jnp.maximum(cin(u + p["up_i_b"][None, :, None, None],
                        p["gamma_u"][y], p["beta_u"][y]), 0.0)
    mid = jnp.concatenate([h, u], axis=1)
    # ConvT(4, s=2, p=3) == conv(lhs_dilation=2, pad=k-1-p=0) with flipped,
    # in/out-transposed kernel.
    w_t = jnp.flip(p["up_o_w"], axis=(-2, -1)).transpose(1, 0, 2, 3)
    o = jax.lax.conv_general_dilated(
        mid, w_t, window_strides=(1, 1), padding=[(0, 0), (0, 0)],
        lhs_dilation=(2, 2), dimension_numbers=("NCHW", "OIHW", "NCHW"),
        precision=jax.lax.Precision.HIGHEST)
    return jnp.tanh(o + p["up_o_b"][None, :, None, None])


# ----------------------------------------------------------------------------

if __name__ == "__main__":
    key = jax.random.PRNGKey(0)
    N, CIN, H, W = 4, 1, 28, 28        # MNIST-style outermost block
    NGF, NGF2, NCLS = 8, 16, 10        # -> B=2 samples/step, grid of 2 steps

    k_params, k_x, k_y = jax.random.split(key, 3)
    params = init_params(k_params, CIN, NGF, NGF2, NCLS)
    x = jax.random.normal(k_x, (N, CIN, H, W), jnp.float32)
    y = jax.random.randint(k_y, (N,), 0, NCLS)

    out = jax.jit(unet_forward)(x, y, params)
    jax.block_until_ready(out)

    assert out.shape == (N, CIN, H, W), out.shape
    assert out.dtype == jnp.float32
    assert bool(jnp.all(jnp.isfinite(out)))
    assert bool(jnp.all(jnp.abs(out) <= 1.0 + 1e-6))  # tanh output range

    ref = ref_forward(x, y, params)
    err = float(jnp.max(jnp.abs(out - ref)))
    # With f32 MXU passes this error is ~1e-5; the bound is left at 2e-2 so the
    # check stays robust if the compiler picks single-pass bf16 for f32 dots.
    # A phase/tap mis-ordering in the ConvT decomposition produces O(1) errors,
    # far above this bound either way.
    assert err < 2e-2, f"max abs err vs reference: {err}"

    print("KERNEL_OK")
</pallas_src>

<mosaic_0001>
module attributes {stable_mosaic.version = 11 : i64} {
  func.func @_fused_unet_kernel(%arg0: i32, %arg1: memref<1x16x512xf32, #tpu.memory_space<vmem>>, %arg2: memref<2x48x2xf32, #tpu.memory_space<vmem>>, %arg3: memref<512x2xf32, #tpu.memory_space<vmem>>, %arg4: memref<2x512xf32, #tpu.memory_space<vmem>>, %arg5: memref<8x16xf32, #tpu.memory_space<vmem>>, %arg6: memref<8x1xf32, #tpu.memory_space<vmem>>, %arg7: memref<16x8xf32, #tpu.memory_space<vmem>>, %arg8: memref<16x1xf32, #tpu.memory_space<vmem>>, %arg9: memref<8x16xf32, #tpu.memory_space<vmem>>, %arg10: memref<8x1xf32, #tpu.memory_space<vmem>>, %arg11: memref<4x144xf32, #tpu.memory_space<vmem>>, %arg12: memref<4x1xf32, #tpu.memory_space<vmem>>, %arg13: memref<1x4x512xf32, #tpu.memory_space<vmem>>, %arg14: memref<16x640xf32, #tpu.memory_space<vmem>>) attributes {dimension_semantics = [#tpu.dimension_semantics<parallel>], iteration_bounds = array<i64: 2>, scalar_prefetch = 0 : i64, scratch_operands = 1 : i64, tpu.core_type = #tpu.core_type<tc>, window_params = [{transform_indices = @transform_0, window_bounds = array<i64: 1, 16, 512>}, {pipeline_mode = #tpu.pipeline_mode<synchronous>, transform_indices = @transform_1, window_bounds = array<i64: 2, 48, 2>}, {pipeline_mode = #tpu.pipeline_mode<synchronous>, transform_indices = @transform_2, window_bounds = array<i64: 512, 2>}, {pipeline_mode = #tpu.pipeline_mode<synchronous>, transform_indices = @transform_3, window_bounds = array<i64: 2, 512>}, {pipeline_mode = #tpu.pipeline_mode<synchronous>, transform_indices = @transform_4, window_bounds = array<i64: 8, 16>}, {pipeline_mode = #tpu.pipeline_mode<synchronous>, transform_indices = @transform_5, window_bounds = array<i64: 8, 1>}, {pipeline_mode = #tpu.pipeline_mode<synchronous>, transform_indices = @transform_6, window_bounds = array<i64: 16, 8>}, {pipeline_mode = #tpu.pipeline_mode<synchronous>, transform_indices = @transform_7, window_bounds = array<i64: 16, 1>}, {pipeline_mode = #tpu.pipeline_mode<synchronous>, transform_indices = @transform_8, window_bounds = array<i64: 8, 16>}, {pipeline_mode = #tpu.pipeline_mode<synchronous>, transform_indices = @transform_9, window_bounds = array<i64: 8, 1>}, {pipeline_mode = #tpu.pipeline_mode<synchronous>, transform_indices = @transform_10, window_bounds = array<i64: 4, 144>}, {pipeline_mode = #tpu.pipeline_mode<synchronous>, transform_indices = @transform_11, window_bounds = array<i64: 4, 1>}, {transform_indices = @transform_12, window_bounds = array<i64: 1, 4, 512>}]} {
    %c0 = arith.constant 0 : index
    %c0_0 = arith.constant 0 : index
    %0 = vector.load %arg3[%c0, %c0_0] : memref<512x2xf32, #tpu.memory_space<vmem>>, vector<512x2xf32>
    %c0_1 = arith.constant 0 : index
    %c0_2 = arith.constant 0 : index
    %1 = vector.load %arg4[%c0_1, %c0_2] : memref<2x512xf32, #tpu.memory_space<vmem>>, vector<2x512xf32>
    %c0_3 = arith.constant 0 : index
    %c0_4 = arith.constant 0 : index
    %c0_5 = arith.constant 0 : index
    %2 = vector.load %arg1[%c0_3, %c0_4, %c0_5] : memref<1x16x512xf32, #tpu.memory_space<vmem>>, vector<1x16x512xf32>
    %3 = vector.shape_cast %2 : vector<1x16x512xf32> to vector<16x512xf32>
    %c0_6 = arith.constant 0 : index
    %c0_7 = arith.constant 0 : index
    %4 = vector.load %arg5[%c0_6, %c0_7] : memref<8x16xf32, #tpu.memory_space<vmem>>, vector<8x16xf32>
    %cst = arith.constant dense<0.000000e+00> : vector<8x512xf32>
    %5 = tpu.matmul %4, %3, %cst {dimension_numbers = #tpu.dot_dimension_numbers<[1], [0], [0], [1], [0, 0, 1, 1], [], []>} : vector<8x16xf32>, vector<16x512xf32>, vector<8x512xf32> -> vector<8x512xf32>
    %c0_8 = arith.constant 0 : index
    %c0_9 = arith.constant 0 : index
    %6 = vector.load %arg6[%c0_8, %c0_9] : memref<8x1xf32, #tpu.memory_space<vmem>>, vector<8x1xf32>
    %7 = vector.broadcast %6 : vector<8x1xf32> to vector<8x512xf32>
    %8 = arith.addf %5, %7 : vector<8x512xf32>
    %cst_10 = arith.constant 0.000000e+00 : f32
    %9 = vector.broadcast %cst_10 : f32 to vector<8x512xf32>
    %10 = arith.maximumf %8, %9 : vector<8x512xf32>
    %11 = arith.index_cast %arg0 : i32 to index
    %c0_11 = arith.constant 0 : index
    %c0_12 = arith.constant 0 : index
    %12 = vector.load %arg2[%11, %c0_11, %c0_12] : memref<2x48x2xf32, #tpu.memory_space<vmem>>, vector<1x48x2xf32>
    %13 = vector.shape_cast %12 : vector<1x48x2xf32> to vector<48x2xf32>
    %14 = vector.extract_strided_slice %13 {offsets = [0, 0], sizes = [16, 2], strides = [1, 1]} : vector<48x2xf32> to vector<16x2xf32>
    %15 = vector.extract_strided_slice %13 {offsets = [16, 0], sizes = [16, 2], strides = [1, 1]} : vector<48x2xf32> to vector<16x2xf32>
    %16 = vector.extract_strided_slice %13 {offsets = [32, 0], sizes = [8, 2], strides = [1, 1]} : vector<48x2xf32> to vector<8x2xf32>
    %17 = vector.extract_strided_slice %13 {offsets = [40, 0], sizes = [8, 2], strides = [1, 1]} : vector<48x2xf32> to vector<8x2xf32>
    %c0_13 = arith.constant 0 : index
    %c0_14 = arith.constant 0 : index
    %18 = vector.load %arg7[%c0_13, %c0_14] : memref<16x8xf32, #tpu.memory_space<vmem>>, vector<16x8xf32>
    %cst_15 = arith.constant dense<0.000000e+00> : vector<16x512xf32>
    %19 = tpu.matmul %18, %10, %cst_15 {dimension_numbers = #tpu.dot_dimension_numbers<[1], [0], [0], [1], [0, 0, 1, 1], [], []>} : vector<16x8xf32>, vector<8x512xf32>, vector<16x512xf32> -> vector<16x512xf32>
    %c0_16 = arith.constant 0 : index
    %c0_17 = arith.constant 0 : index
    %20 = vector.load %arg8[%c0_16, %c0_17] : memref<16x1xf32, #tpu.memory_space<vmem>>, vector<16x1xf32>
    %21 = vector.broadcast %20 : vector<16x1xf32> to vector<16x512xf32>
    %22 = arith.addf %19, %21 : vector<16x512xf32>
    %cst_18 = arith.constant dense<0.000000e+00> : vector<16x2xf32>
    %23 = tpu.matmul %22, %0, %cst_18 {dimension_numbers = #tpu.dot_dimension_numbers<[1], [0], [0], [1], [0, 0, 1, 1], [], []>} : vector<16x512xf32>, vector<512x2xf32>, vector<16x2xf32> -> vector<16x2xf32>
    %cst_19 = arith.constant 3.906250e-03 : f32
    %24 = vector.broadcast %cst_19 : f32 to vector<16x2xf32>
    %25 = arith.mulf %23, %24 : vector<16x2xf32>
    %26 = arith.mulf %22, %22 : vector<16x512xf32>
    %cst_20 = arith.constant dense<0.000000e+00> : vector<16x2xf32>
    %27 = tpu.matmul %26, %0, %cst_20 {dimension_numbers = #tpu.dot_dimension_numbers<[1], [0], [0], [1], [0, 0, 1, 1], [], []>} : vector<16x512xf32>, vector<512x2xf32>, vector<16x2xf32> -> vector<16x2xf32>
    %cst_21 = arith.constant 3.906250e-03 : f32
    %28 = vector.broadcast %cst_21 : f32 to vector<16x2xf32>
    %29 = arith.mulf %27, %28 : vector<16x2xf32>
    %30 = arith.mulf %25, %25 : vector<16x2xf32>
    %31 = arith.subf %29, %30 : vector<16x2xf32>
    %cst_22 = arith.constant 9.99999974E-6 : f32
    %32 = vector.broadcast %cst_22 : f32 to vector<16x2xf32>
    %33 = arith.addf %31, %32 : vector<16x2xf32>
    %34 = math.rsqrt %33 : vector<16x2xf32>
    %35 = arith.mulf %34, %14 : vector<16x2xf32>
    %36 = arith.mulf %25, %35 : vector<16x2xf32>
    %37 = arith.subf %15, %36 : vector<16x2xf32>
    %cst_23 = arith.constant dense<0.000000e+00> : vector<16x512xf32>
    %38 = tpu.matmul %35, %1, %cst_23 {dimension_numbers = #tpu.dot_dimension_numbers<[1], [0], [0], [1], [0, 0, 1, 1], [], []>} : vector<16x2xf32>, vector<2x512xf32>, vector<16x512xf32> -> vector<16x512xf32>
    %39 = arith.mulf %22, %38 : vector<16x512xf32>
    %cst_24 = arith.constant dense<0.000000e+00> : vector<16x512xf32>
    %40 = tpu.matmul %37, %1, %cst_24 {dimension_numbers = #tpu.dot_dimension_numbers<[1], [0], [0], [1], [0, 0, 1, 1], [], []>} : vector<16x2xf32>, vector<2x512xf32>, vector<16x512xf32> -> vector<16x512xf32>
    %41 = arith.addf %39, %40 : vector<16x512xf32>
    %cst_25 = arith.constant 0.000000e+00 : f32
    %42 = vector.broadcast %cst_25 : f32 to vector<16x512xf32>
    %43 = arith.maximumf %41, %42 : vector<16x512xf32>
    %c0_26 = arith.constant 0 : index
    %c0_27 = arith.constant 0 : index
    %44 = vector.load %arg9[%c0_26, %c0_27] : memref<8x16xf32, #tpu.memory_space<vmem>>, vector<8x16xf32>
    %cst_28 = arith.constant dense<0.000000e+00> : vector<8x512xf32>
    %45 = tpu.matmul %44, %43, %cst_28 {dimension_numbers = #tpu.dot_dimension_numbers<[1], [0], [0], [1], [0, 0, 1, 1], [], []>} : vector<8x16xf32>, vector<16x512xf32>, vector<8x512xf32> -> vector<8x512xf32>
    %c0_29 = arith.constant 0 : index
    %c0_30 = arith.constant 0 : index
    %46 = vector.load %arg10[%c0_29, %c0_30] : memref<8x1xf32, #tpu.memory_space<vmem>>, vector<8x1xf32>
    %47 = vector.broadcast %46 : vector<8x1xf32> to vector<8x512xf32>
    %48 = arith.addf %45, %47 : vector<8x512xf32>
    %cst_31 = arith.constant dense<0.000000e+00> : vector<8x2xf32>
    %49 = tpu.matmul %48, %0, %cst_31 {dimension_numbers = #tpu.dot_dimension_numbers<[1], [0], [0], [1], [0, 0, 1, 1], [], []>} : vector<8x512xf32>, vector<512x2xf32>, vector<8x2xf32> -> vector<8x2xf32>
    %cst_32 = arith.constant 3.906250e-03 : f32
    %50 = vector.broadcast %cst_32 : f32 to vector<8x2xf32>
    %51 = arith.mulf %49, %50 : vector<8x2xf32>
    %52 = arith.mulf %48, %48 : vector<8x512xf32>
    %cst_33 = arith.constant dense<0.000000e+00> : vector<8x2xf32>
    %53 = tpu.matmul %52, %0, %cst_33 {dimension_numbers = #tpu.dot_dimension_numbers<[1], [0], [0], [1], [0, 0, 1, 1], [], []>} : vector<8x512xf32>, vector<512x2xf32>, vector<8x2xf32> -> vector<8x2xf32>
    %cst_34 = arith.constant 3.906250e-03 : f32
    %54 = vector.broadcast %cst_34 : f32 to vector<8x2xf32>
    %55 = arith.mulf %53, %54 : vector<8x2xf32>
    %56 = arith.mulf %51, %51 : vector<8x2xf32>
    %57 = arith.subf %55, %56 : vector<8x2xf32>
    %cst_35 = arith.constant 9.99999974E-6 : f32
    %58 = vector.broadcast %cst_35 : f32 to vector<8x2xf32>
    %59 = arith.addf %57, %58 : vector<8x2xf32>
    %60 = math.rsqrt %59 : vector<8x2xf32>
    %61 = arith.mulf %60, %16 : vector<8x2xf32>
    %62 = arith.mulf %51, %61 : vector<8x2xf32>
    %63 = arith.subf %17, %62 : vector<8x2xf32>
    %cst_36 = arith.constant dense<0.000000e+00> : vector<8x512xf32>
    %64 = tpu.matmul %61, %1, %cst_36 {dimension_numbers = #tpu.dot_dimension_numbers<[1], [0], [0], [1], [0, 0, 1, 1], [], []>} : vector<8x2xf32>, vector<2x512xf32>, vector<8x512xf32> -> vector<8x512xf32>
    %65 = arith.mulf %48, %64 : vector<8x512xf32>
    %cst_37 = arith.constant dense<0.000000e+00> : vector<8x512xf32>
    %66 = tpu.matmul %63, %1, %cst_37 {dimension_numbers = #tpu.dot_dimension_numbers<[1], [0], [0], [1], [0, 0, 1, 1], [], []>} : vector<8x2xf32>, vector<2x512xf32>, vector<8x512xf32> -> vector<8x512xf32>
    %67 = arith.addf %65, %66 : vector<8x512xf32>
    %cst_38 = arith.constant 0.000000e+00 : f32
    %68 = vector.broadcast %cst_38 : f32 to vector<8x512xf32>
    %69 = arith.maximumf %67, %68 : vector<8x512xf32>
    %c0_39 = arith.constant 0 : index
    %c0_40 = arith.constant 0 : index
    %70 = vector.load %arg14[%c0_39, %c0_40] : memref<16x640xf32, #tpu.memory_space<vmem>>, vector<8x512xf32>
    tpu.vector_store %arg14[%c0_39, %c0_40], %10 {strides = array<i32>} : memref<16x640xf32, #tpu.memory_space<vmem>>, vector<8x512xf32>,
    %c8 = arith.constant 8 : index
    %c0_41 = arith.constant 0 : index
    %71 = vector.load %arg14[%c8, %c0_41] : memref<16x640xf32, #tpu.memory_space<vmem>>, vector<8x512xf32>
    tpu.vector_store %arg14[%c8, %c0_41], %69 {strides = array<i32>} : memref<16x640xf32, #tpu.memory_space<vmem>>, vector<8x512xf32>,
    %cst_42 = arith.constant 0.000000e+00 : f32
    %72 = vector.broadcast %cst_42 : f32 to vector<16x128xf32>
    %c0_43 = arith.constant 0 : index
    %c512 = arith.constant 512 : index
    %73 = vector.load %arg14[%c0_43, %c512] : memref<16x640xf32, #tpu.memory_space<vmem>>, vector<16x128xf32>
    tpu.vector_store %arg14[%c0_43, %c512], %72 {strides = array<i32>} : memref<16x640xf32, #tpu.memory_space<vmem>>, vector<16x128xf32>,
    %c0_44 = arith.constant 0 : index
    %c0_45 = arith.constant 0 : index
    %74 = vector.load %arg14[%c0_44, %c0_45] : memref<16x640xf32, #tpu.memory_space<vmem>>, vector<16x512xf32>
    %c0_46 = arith.constant 0 : index
    %c1 = arith.constant 1 : index
    %75 = vector.load %arg14[%c0_46, %c1] : memref<16x640xf32, #tpu.memory_space<vmem>>, vector<16x512xf32>
    %c0_47 = arith.constant 0 : index
    %c2 = arith.constant 2 : index
    %76 = vector.load %arg14[%c0_47, %c2] : memref<16x640xf32, #tpu.memory_space<vmem>>, vector<16x512xf32>
    %c0_48 = arith.constant 0 : index
    %c16 = arith.constant 16 : index
    %77 = vector.load %arg14[%c0_48, %c16] : memref<16x640xf32, #tpu.memory_space<vmem>>, vector<16x512xf32>
    %c0_49 = arith.constant 0 : index
    %c17 = arith.constant 17 : index
    %78 = vector.load %arg14[%c0_49, %c17] : memref<16x640xf32, #tpu.memory_space<vmem>>, vector<16x512xf32>
    %c0_50 = arith.constant 0 : index
    %c18 = arith.constant 18 : index
    %79 = vector.load %arg14[%c0_50, %c18] : memref<16x640xf32, #tpu.memory_space<vmem>>, vector<16x512xf32>
    %c0_51 = arith.constant 0 : index
    %c32 = arith.constant 32 : index
    %80 = vector.load %arg14[%c0_51, %c32] : memref<16x640xf32, #tpu.memory_space<vmem>>, vector<16x512xf32>
    %c0_52 = arith.constant 0 : index
    %c33 = arith.constant 33 : index
    %81 = vector.load %arg14[%c0_52, %c33] : memref<16x640xf32, #tpu.memory_space<vmem>>, vector<16x512xf32>
    %c0_53 = arith.constant 0 : index
    %c34 = arith.constant 34 : index
    %82 = vector.load %arg14[%c0_53, %c34] : memref<16x640xf32, #tpu.memory_space<vmem>>, vector<16x512xf32>
    %83 = tpu.concatenate %74, %75, %76, %77, %78, %79, %80, %81, %82 in 0 : vector<16x512xf32>, vector<16x512xf32>, vector<16x512xf32>, vector<16x512xf32>, vector<16x512xf32>, vector<16x512xf32>, vector<16x512xf32>, vector<16x512xf32>, vector<16x512xf32> -> vector<144x512xf32>
    %c0_54 = arith.constant 0 : index
    %c0_55 = arith.constant 0 : index
    %84 = vector.load %arg11[%c0_54, %c0_55] : memref<4x144xf32, #tpu.memory_space<vmem>>, vector<4x144xf32>
    %cst_56 = arith.constant dense<0.000000e+00> : vector<4x512xf32>
    %85 = tpu.matmul %84, %83, %cst_56 {dimension_numbers = #tpu.dot_dimension_numbers<[1], [0], [0], [1], [0, 0, 1, 1], [], []>} : vector<4x144xf32>, vector<144x512xf32>, vector<4x512xf32> -> vector<4x512xf32>
    %c0_57 = arith.constant 0 : index
    %c0_58 = arith.constant 0 : index
    %86 = vector.load %arg12[%c0_57, %c0_58] : memref<4x1xf32, #tpu.memory_space<vmem>>, vector<4x1xf32>
    %87 = vector.broadcast %86 : vector<4x1xf32> to vector<4x512xf32>
    %88 = arith.addf %85, %87 : vector<4x512xf32>
    %89 = math.tanh %88 : vector<4x512xf32>
    %c0_59 = arith.constant 0 : index
    %c0_60 = arith.constant 0 : index
    %c0_61 = arith.constant 0 : index
    %90 = vector.load %arg13[%c0_59, %c0_60, %c0_61] : memref<1x4x512xf32, #tpu.memory_space<vmem>>, vector<1x4x512xf32>
    %91 = vector.shape_cast %90 : vector<1x4x512xf32> to vector<4x512xf32>
    %92 = vector.shape_cast %89 : vector<4x512xf32> to vector<1x4x512xf32>
    tpu.vector_store %arg13[%c0_59, %c0_60, %c0_61], %92 {strides = array<i32>} : memref<1x4x512xf32, #tpu.memory_space<vmem>>, vector<1x4x512xf32>,
    return
  }
  func.func @transform_0(%arg0: i32) -> (i32, i32, i32) {
    %c0_i32 = arith.constant 0 : i32
    %c0_i32_0 = arith.constant 0 : i32
    %c0_i32_1 = arith.constant 0 : i32
    return %arg0, %c0_i32, %c0_i32_0 : i32, i32, i32
  }
  func.func @transform_1(%arg0: i32) -> (i32, i32, i32) {
    %c0_i32 = arith.constant 0 : i32
    %c0_i32_0 = arith.constant 0 : i32
    %c0_i32_1 = arith.constant 0 : i32
    %c0_i32_2 = arith.constant 0 : i32
    return %c0_i32, %c0_i32_0, %c0_i32_1 : i32, i32, i32
  }
  func.func @transform_2(%arg0: i32) -> (i32, i32) {
    %c0_i32 = arith.constant 0 : i32
    %c0_i32_0 = arith.constant 0 : i32
    %c0_i32_1 = arith.constant 0 : i32
    return %c0_i32, %c0_i32_0 : i32, i32
  }
  func.func @transform_3(%arg0: i32) -> (i32, i32) {
    %c0_i32 = arith.constant 0 : i32
    %c0_i32_0 = arith.constant 0 : i32
    %c0_i32_1 = arith.constant 0 : i32
    return %c0_i32, %c0_i32_0 : i32, i32
  }
  func.func @transform_4(%arg0: i32) -> (i32, i32) {
    %c0_i32 = arith.constant 0 : i32
    %c0_i32_0 = arith.constant 0 : i32
    %c0_i32_1 = arith.constant 0 : i32
    return %c0_i32, %c0_i32_0 : i32, i32
  }
  func.func @transform_5(%arg0: i32) -> (i32, i32) {
    %c0_i32 = arith.constant 0 : i32
    %c0_i32_0 = arith.constant 0 : i32
    %c0_i32_1 = arith.constant 0 : i32
    return %c0_i32, %c0_i32_0 : i32, i32
  }
  func.func @transform_6(%arg0: i32) -> (i32, i32) {
    %c0_i32 = arith.constant 0 : i32
    %c0_i32_0 = arith.constant 0 : i32
    %c0_i32_1 = arith.constant 0 : i32
    return %c0_i32, %c0_i32_0 : i32, i32
  }
  func.func @transform_7(%arg0: i32) -> (i32, i32) {
    %c0_i32 = arith.constant 0 : i32
    %c0_i32_0 = arith.constant 0 : i32
    %c0_i32_1 = arith.constant 0 : i32
    return %c0_i32, %c0_i32_0 : i32, i32
  }
  func.func @transform_8(%arg0: i32) -> (i32, i32) {
    %c0_i32 = arith.constant 0 : i32
    %c0_i32_0 = arith.constant 0 : i32
    %c0_i32_1 = arith.constant 0 : i32
    return %c0_i32, %c0_i32_0 : i32, i32
  }
  func.func @transform_9(%arg0: i32) -> (i32, i32) {
    %c0_i32 = arith.constant 0 : i32
    %c0_i32_0 = arith.constant 0 : i32
    %c0_i32_1 = arith.constant 0 : i32
    return %c0_i32, %c0_i32_0 : i32, i32
  }
  func.func @transform_10(%arg0: i32) -> (i32, i32) {
    %c0_i32 = arith.constant 0 : i32
    %c0_i32_0 = arith.constant 0 : i32
    %c0_i32_1 = arith.constant 0 : i32
    return %c0_i32, %c0_i32_0 : i32, i32
  }
  func.func @transform_11(%arg0: i32) -> (i32, i32) {
    %c0_i32 = arith.constant 0 : i32
    %c0_i32_0 = arith.constant 0 : i32
    %c0_i32_1 = arith.constant 0 : i32
    return %c0_i32, %c0_i32_0 : i32, i32
  }
  func.func @transform_12(%arg0: i32) -> (i32, i32, i32) {
    %c0_i32 = arith.constant 0 : i32
    %c0_i32_0 = arith.constant 0 : i32
    %c0_i32_1 = arith.constant 0 : i32
    return %arg0, %c0_i32, %c0_i32_0 : i32, i32, i32
  }
}

</mosaic_0001>

<bundles_post_ra>
// kernel: tile.7
= control target key start
LH: loop header
LB: loop body
LE: loop exit
PB: predicated region body
PF: predicated region fallthrough
CT: control target
= control target key end

     0   :  { %s20_s0 = inlined_call_operand.<no memory space> [shape: f32[], index: 0, kind: input, shape index: {}]   ;;  %s21_s1 = inlined_call_operand.vmem [shape: f32[4,1], index: 1, kind: output, shape index: {}]  }
   0x1   :  { %v2_v0 = vstv %s20_s0 }
   0x2   :  { %3 = vst [vmem:[%s21_s1] sm:$0xf] %v2_v0 }

// kernel: unet_forward.1
= control target key start
LH: loop header
LB: loop body
LE: loop exit
PB: predicated region body
PF: predicated region fallthrough
CT: control target
= control target key end

     0   :  { %s2629_s21 = smov 0   ;;  %s3886_s0 = inlined_call_operand.vmem [shape: f32[2,16,512], index: 0, kind: input, shape index: {}]   ;;  %s3887_s1 = inlined_call_operand.vmem [shape: f32[2,48,2], index: 1, kind: input, shape index: {}]   ;;  %s3888_s2 = inlined_call_operand.vmem [shape: f32[512,2], index: 2, kind: input, shape index: {}]   ;;  %s3889_s3 = inlined_call_operand.vmem [shape: f32[2,512], index: 3, kind: input, shape index: {}]   ;;  %s3890_s4 = inlined_call_operand.vmem [shape: f32[8,16], index: 4, kind: input, shape index: {}]   ;;  %s3891_s5 = inlined_call_operand.vmem [shape: f32[8,1], index: 5, kind: input, shape index: {}]   ;;  %s3892_s6 = inlined_call_operand.vmem [shape: f32[16,8], index: 6, kind: input, shape index: {}]   ;;  %s3893_s7 = inlined_call_operand.vmem [shape: f32[16,1], index: 7, kind: input, shape index: {}]   ;;  %s3894_s8 = inlined_call_operand.vmem [shape: f32[8,16], index: 8, kind: input, shape index: {}]   ;;  %s3895_s9 = inlined_call_operand.vmem [shape: f32[8,1], index: 9, kind: input, shape index: {}]   ;;  %s3896_s10 = inlined_call_operand.vmem [shape: f32[4,144], index: 10, kind: input, shape index: {}]   ;;  %s3897_s11 = inlined_call_operand.vmem [shape: f32[4,1], index: 11, kind: input, shape index: {}]   ;;  %s3898_s12 = inlined_call_operand.vmem [shape: f32[2,4,512], index: 12, kind: output, shape index: {}]  }
   0x1 LB: > { %s2635_s22 = sadd.s32 4294967295, %s2552_s21   ;;  %p2242_p0 = scmp.ge.s32.totalorder %s2552_s21, 1  ;;  %s2552_s21 = sphi %s2629_s21, %s22_s21  }
   0x2   : > { %p362_p1 = scmp.lt.s32.totalorder %s2552_s21, 3 }
   0x4   : > { %p363_p2 = pnand %p2242_p0, %p362_p1 }
   0x6   : > { %366 = sbr.rel (%p363_p2) target bundleno = 1435 (0x59b), region = 68 }
   0xb   : > { %p404_p3 = scmp.lt.s32.totalorder %s2635_s22, 1  ;;  %v488_v0 = vld [vmem:[%s3891_s5] sm:$0xff]  ;;  %v2554_v1 = vmov 0   ;;  %v593_v2 = vld [vmem:[%s3893_s7 + $0x8] sm:$0xff]  ;;  %vm494_vm0 = vcmask 130048   ;;  %vm604_vm1 = vcmask 64512  }
   0xc   : > { %2329 = vset.pattern.permute.xlu0 %v2554_v1  ;;  %2330 = vset.pattern.permute.xlu1 %v2554_v1  ;;  %v487_v3 = vld [vmem:[%s3890_s4] sm:$0xff]  ;;  %v3899_v22 = vmov 0.0   ;;  %s2556_s24 = smov 96   ;;  %s2557_s25 = smov 95   ;;  %v591_v28 = vld [vmem:[%s3892_s6 + $0x8] sm:$0xff]  ;;  %v2721_v33 = vld [vmem:[%s3888_s2 + $0x78] sm:$0xff] }
   0xd   : > { %s2647_s27 = scalar_select %p404_p3, %s2635_s22, 1  ;;  %491 = vperm.xlu0 %2329, %v488_v0   ;;  %601 = vperm.xlu1 %2330, %v593_v2   ;;  %v592_v11 = vld [vmem:[%s3893_s7] sm:$0xff]  ;;  %v2726_v34 = vld [vmem:[%s3888_s2 + $0xf8] sm:$0xff]  ;;  %v2733_v35 = vld [vmem:[%s3888_s2 + $0x70] sm:$0xff]  ;;  %vm1714_vm2 = vcmask 1039360   ;;  %vm1936_vm3 = vcmask 777216  }
   0xe   : > { %2531 = vset.pattern.permute.xlu2 %v2554_v1  ;;  %v1181_v12 = vld [vmem:[%s3895_s9] sm:$0xff]  ;;  %s2558_s26 = smov 127   ;;  %s2559_s30 = smov 112   ;;  %v2738_v36 = vld [vmem:[%s3888_s2 + $0xf0] sm:$0xff]  ;;  %v2743_v37 = vld [vmem:[%s3888_s2 + $0x68] sm:$0xff]  ;;  %vm944_vm4 = vcmask 1041408  }
   0xf   : > { %s2309_s28 = sshll.u32 %s2647_s27, 6  ;;  %v590_v20 = vld [vmem:[%s3892_s6] sm:$0xff]  ;;  %s2561_s14 = smov 110   ;;  %v2750_v38 = vld [vmem:[%s3888_s2 + $0xe8] sm:$0xff]  ;;  %v2771_v42 = vld [vmem:[%s3888_s2 + $0x58] sm:$0xff]  ;;  %vm937_vm8 = vcmask 15360  }
  0x10   : > { %s408_s13 = scalar_lea.vmem %s3886_s0, %s2309_s28  ;;  %s2562_s15 = smov 94   ;;  %v2755_v39 = vld [vmem:[%s3888_s2 + $0x60] sm:$0xff]  ;;  %v2783_v43 = vld [vmem:[%s3888_s2 + $0xd8] sm:$0xff]  ;;  %v2804_v45 = vld [vmem:[%s3888_s2 + $0x50] sm:$0xff]  ;;  %vm1899_vm15 = vcmask 785408  }
  0x11   : > { %v483_v4 = vld [vmem:[%s408_s13 + $0x20] sm:$0xff]  ;;  %v484_v5 = vld [vmem:[%s408_s13 + $0x28] sm:$0xff]  ;;  %v485_v6 = vld [vmem:[%s408_s13 + $0x30] sm:$0xff]  ;;  %s582_s18 = smul.u32 48, %s2635_s22  ;;  %s2563_s17 = smov 126  }
  0x12   : > { %512 = vmatpush.msra.mxu0 %v483_v4  ;;  %532 = vmatpush.msra.mxu1 %v484_v5  ;;  %v479_v7 = vld [vmem:[%s408_s13] sm:$0xff]  ;;  %v480_v8 = vld [vmem:[%s408_s13 + $0x8] sm:$0xff]  ;;  %v481_v9 = vld [vmem:[%s408_s13 + $0x10] sm:$0xff] }
  0x13   : > { %552 = vmatpush.msra.mxu2 %v485_v6  ;;  %v486_v10 = vld [vmem:[%s408_s13 + $0x38] sm:$0xff]  ;;  %v2766_v41 = vld [vmem:[%s3888_s2 + $0xe0] sm:$0xff]  ;;  %v2809_v46 = vld [vmem:[%s3888_s2 + $0xd0] sm:$0xff]  ;;  %s3295_s23 = scalar_lea.vmem %s3887_s1, %s582_s18 }
  0x14   : > { %513 = vmatpush.msra.mxu0 %v479_v7  ;;  %533 = vmatpush.msra.mxu1 %v480_v8  ;;  %v482_v13 = vld [vmem:[%s408_s13 + $0x18] sm:$0xff]  ;;  %s2560_s13 = smov 111   ;;  %v2814_v47 = vld [vmem:[%s3888_s2 + $0x48] sm:$0xff]  ;;  %v2832_v50 = vld [vmem:[%s3888_s2 + $0x40] sm:$0xff] }
  0x15   : > { %553 = vmatpush.msra.mxu2 %v481_v9  ;;  %2247 = vmatmul.msk.f32.vlgmr.msra.gmra.mxu0 %vm494_vm0, %v487_v3  ;;  %v2821_v48 = vld [vmem:[%s3888_s2 + $0xc8] sm:$0xff]  ;;  %v2826_v49 = vld [vmem:[%s3888_s2 + $0x178] sm:$0xff]  ;;  %v2837_v51 = vld [vmem:[%s3888_s2 + $0xc0] sm:$0xff] }
  0x16   : > { %2248 = vmatmul.msk.f32.vlgmr.msra.gmra.mxu1 %vm494_vm0, %v487_v3  ;;  %2249 = vmatmul.msk.f32.vlgmr.msra.gmra.mxu2 %vm494_vm0, %v487_v3  ;;  %4005 = vst [vmem:[#allocation10_spill] sm:$0xff] %v2821_v48  ;;  %v2842_v52 = vld [vmem:[%s3888_s2 + $0x170] sm:$0xff]  ;;  %v2849_v53 = vld [vmem:[%s3888_s2 + $0x168] sm:$0xff]  ;;  %v2855_v54 = vld [vmem:[%s3888_s2 + $0x38] sm:$0xff] }
  0x17   : > { %572 = vmatpush.msrb.mxu2 %v486_v10  ;;  %596 = vperm.xlu0 %2329, %v592_v11   ;;  %4006 = vst [vmem:[#allocation11_spill] sm:$0xff] %v2837_v51  ;;  %v2860_v55 = vld [vmem:[%s3888_s2 + $0xb8] sm:$0xff]  ;;  %v2870_v56 = vld [vmem:[%s3888_s2 + $0x30] sm:$0xff]  ;;  %v2880_v58 = vld [vmem:[%s3888_s2 + $0x160] sm:$0xff] }
  0x18   : > { %1184 = vperm.xlu1 %2330, %v1181_v12   ;;  %v2875_v57 = vld [vmem:[%s3888_s2 + $0xb0] sm:$0xff]  ;;  %v2887_v59 = vld [vmem:[%s3888_s2 + $0x28] sm:$0xff]  ;;  %v2897_v61 = vld [vmem:[%s3888_s2 + $0x158] sm:$0xff] }
  0x19   : > { %573 = vmatpush.msrb.mxu2 %v482_v13  ;;  %4007 = vst [vmem:[#allocation12_spill] sm:$0xff] %v2875_v57  ;;  %v2892_v60 = vld [vmem:[%s3888_s2 + $0xa8] sm:$0xff]  ;;  %v2903_v62 = vld [vmem:[%s3888_s2 + $0x1f8] sm:$0xff]  ;;  %v2908_v63 = vld [vmem:[%s3888_s2 + $0x20] sm:$0xff] }
  0x1a   : > { %4008 = vst [vmem:[#allocation13_spill] sm:$0xff] %v2887_v59  ;;  %v2913_v0 = vld [vmem:[%s3888_s2 + $0xa0] sm:$0xff]  ;;  %v2920_v1 = vld [vmem:[%s3888_s2 + $0x150] sm:$0xff]  ;;  %v2937_v4 = vld [vmem:[%s3888_s2 + $0x98] sm:$0xff] }
  0x1b   : > { %4009 = vst [vmem:[#allocation14_spill] sm:$0xff] %v2892_v60  ;;  %v2925_v2 = vld [vmem:[%s3888_s2 + $0x1f0] sm:$0xff]  ;;  %v2944_v5 = vld [vmem:[%s3888_s2 + $0x148] sm:$0xff]  ;;  %v2970_v9 = vld [vmem:[%s3888_s2 + $0x140] sm:$0xff] }
  0x1c   : > { %4010 = vst [vmem:[#allocation15_spill] sm:$0xff] %v2908_v63  ;;  %v2949_v6 = vld [vmem:[%s3888_s2 + $0x1e8] sm:$0xff]  ;;  %v2960_v7 = vld [vmem:[%s3888_s2 + $0x10] sm:$0xff]  ;;  %v2977_v10 = vld [vmem:[%s3888_s2 + $0x1e0] sm:$0xff] }
  0x1d   : > { %4011 = vst [vmem:[#allocation16_spill] sm:$0xff] %v2913_v0  ;;  %v2965_v8 = vld [vmem:[%s3888_s2 + $0x90] sm:$0xff]  ;;  %v2982_v11 = vld [vmem:[%s3888_s2 + $0x8] sm:$0xff]  ;;  %v2994_v13 = vld [vmem:[%s3888_s2 + $0x138] sm:$0xff] }
  0x1e   : > { %2250 = vmatmul.msk.f32.vlgmr.msrb.gmra.mxu2 %vm494_vm0, %v487_v3  ;;  %v2932_v3 = vld [vmem:[%s3888_s2 + $0x18] sm:$0xff]  ;;  %4013 = vst [vmem:[#allocation18_spill] sm:$0xff] %v2937_v4  ;;  %v2987_v12 = vld [vmem:[%s3888_s2 + $0x88] sm:$0xff] }
  0x1f   : > { %4012 = vst [vmem:[#allocation17_spill] sm:$0xff] %v2932_v3 }
  0x20   : > { %4014 = vst [vmem:[#allocation19_spill] sm:$0xff] %v2960_v7 }
  0x21   : > { %4015 = vst [vmem:[#allocation20_spill] sm:$0xff] %v2965_v8 }
  0x22   : > { %4016 = vst [vmem:[#allocation21_spill] sm:$0xff] %v2970_v9 }
  0x23   : > { %4017 = vst [vmem:[#allocation22_spill] sm:$0xff] %v2982_v11 }
  0x24   : > { %4018 = vst [vmem:[#allocation23_spill] sm:$0xff] %v2987_v12 }
  0x25   : > { %4019 = vst [vmem:[#allocation24_spill] sm:$0xff] %v2994_v13 }
  0x7f   : > { %v492_v14 = vpop.permute.xlu0 %491 }
  0x92   : > { %v515_v15 = vpop.f32.mrf.mxu0 }
  0x93   : > { %v516_v16 = vadd.f32 %v515_v15, %v492_v14  ;;  %v535_v17 = vpop.f32.mrf.mxu1  ;;  %v3004_v15 = vld [vmem:[%s3888_s2] sm:$0xff] }
  0x94   : > { %v536_v18 = vadd.f32 %v535_v17, %v492_v14  ;;  %4020 = vst [vmem:[#allocation25_spill] sm:$0xff] %v3004_v15  ;;  %v3016_v17 = vld [vmem:[%s3888_s2 + $0x130] sm:$0xff] }
  0x95   : > { %v2666_v19 = vmax.f32 %v516_v16, 0.0  ;;  %v3011_v16 = vld [vmem:[%s3888_s2 + $0x80] sm:$0xff]  ;;  %4022 = vst [vmem:[#allocation27_spill] sm:$0xff] %v3016_v17 }
  0x96   : > { %v2671_v21 = vmax.f32 %v536_v18, 0.0  ;;  %4021 = vst [vmem:[#allocation26_spill] sm:$0xff] %v3011_v16  ;;  %v3021_v18 = vld [vmem:[%s3888_s2 + $0x1d0] sm:$0xff] }
  0x97   : > { %3998 = vst [vmem:[#allocation3_spill] sm:$0xff] %v2666_v19  ;;  %626 = vmatpush.msrb.mxu0 %v2666_v19  ;;  %v2676_v23 = vpack.i.bf16 %v2666_v19, %v3899_v22  ;;  %v3086_v22 = vld [vmem:[%s3888_s2 + $0x108] sm:$0xff] }
  0x98   : > { %3999 = vst [vmem:[#allocation4_spill] sm:$0xff] %v2671_v21  ;;  %649 = vmatpush.msrb.mxu1 %v2671_v21  ;;  %2251 = vmatmul.msk.f32.vlgmr.msrb.gmra.mxu0 %vm604_vm1, %v590_v20  ;;  %v2331_v24 = vpack.i.bf16 %v2671_v21, %v2666_v19  ;;  %v3104_v19 = vld [vmem:[%s3888_s2 + $0x100] sm:$0xff] }
  0x99   : > { %4000 = vst [vmem:[#allocation5_spill] sm:$0xff] %v2676_v23  ;;  %v555_v25 = vpop.f32.mrf.mxu2  ;;  %2253 = vmatmul.msk.f32.vlgmr.msrb.gmra.mxu1 %vm604_vm1, %v590_v20  ;;  %2342 = vrot.lane.b32.xlu0 %v2676_v23, %s2556_s24 }
  0x9a   : > { %v556_v26 = vadd.f32 %v555_v25, %v492_v14  ;;  %2337 = vrot.lane.b32.xlu1 %v2676_v23, %s2557_s25  ;;  %2332 = vrot.lane.b32.xlu2 %v2331_v24, %s2558_s26  ;;  %v3035_v24 = vld [vmem:[%s3888_s2 + $0x1c8] sm:$0xff]  ;;  %v3046_v25 = vld [vmem:[%s3888_s2 + $0x120] sm:$0xff]  ;;  %4031 = vst [vmem:[#allocation36_spill] sm:$0xff] %v3086_v22 }
  0x9b   : > { %703 = vmatpush.msra.mxu0 %v2721_v33  ;;  %726 = vmatpush.msra.mxu1 %v2726_v34  ;;  %4024 = vst [vmem:[#allocation29_spill] sm:$0xff] %v3035_v24 }
  0x9c   : > { %v2688_v27 = vmax.f32 %v556_v26, 0.0  ;;  %4025 = vst [vmem:[#allocation30_spill] sm:$0xff] %v3046_v25  ;;  %v3051_v26 = vld [vmem:[%s3888_s2 + $0x1c0] sm:$0xff] }
  0x9d   : > { %704 = vmatpush.msra.mxu0 %v2733_v35  ;;  %727 = vmatpush.msra.mxu1 %v2738_v36  ;;  %4026 = vst [vmem:[#allocation31_spill] sm:$0xff] %v3051_v26 }
  0x9e   : > { %4001 = vst [vmem:[#allocation6_spill] sm:$0xff] %v2688_v27  ;;  %672 = vmatpush.msra.mxu2 %v2688_v27  ;;  %v2710_v32 = vpack.i.bf16 %v2688_v27, %v2671_v21 }
  0x9f   : > { %2255 = vmatmul.msk.f32.vlgmr.msra.gmra.mxu2 %vm604_vm1, %v590_v20  ;;  %705 = vmatpush.msra.mxu0 %v2743_v37  ;;  %4034 = vst [vmem:[#allocation39_spill] sm:$0xff] %v3104_v19 }
  0xa0   : > { %2252 = vmatmul.msk.f32.gmra.mxu0 %vm604_vm1, %v591_v28  ;;  %4003 = vst [vmem:[#allocation8_spill] sm:$0xff] %v2710_v32  ;;  %728 = vmatpush.msra.mxu1 %v2750_v38 }
  0xa1   : > { %v575_v29 = vpop.f32.mrf.mxu2  ;;  %2254 = vmatmul.msk.f32.gmra.mxu1 %vm604_vm1, %v591_v28  ;;  %2357 = vrot.lane.b32.xlu0 %v2676_v23, %s2559_s30 }
  0xa2   : > { %v576_v30 = vadd.f32 %v575_v29, %v492_v14  ;;  %2352 = vrot.lane.b32.xlu1 %v2676_v23, %s2560_s13  ;;  %2347 = vrot.lane.b32.xlu2 %v2676_v23, %s2561_s14  ;;  %v2999_v14 = vld [vmem:[%s3888_s2 + $0x1d8] sm:$0xff]  ;;  %v3134_v23 = vld [vmem:[%s3888_s2 + $0x188] sm:$0xff] }
  0xa3   : > { %706 = vmatpush.msra.mxu0 %v2755_v39  ;;  %729 = vmatpush.msra.mxu1 %v2766_v41  ;;  %v3063_v29 = vld [vmem:[%s3888_s2 + $0x1b8] sm:$0xff]  ;;  %4038 = vst [vmem:[#allocation43_spill] sm:$0xff] %v3134_v23 }
  0xa4   : > { %v2703_v31 = vmax.f32 %v576_v30, 0.0  ;;  %749 = vmatpush.msrb.mxu2 %v2826_v49  ;;  %4028 = vst [vmem:[#allocation33_spill] sm:$0xff] %v3063_v29  ;;  %v3072_v30 = vld [vmem:[%s3888_s2 + $0x110] sm:$0xff] }
  0xa5   : > { %707 = vmatpush.msra.mxu0 %v2771_v42  ;;  %730 = vmatpush.msra.mxu1 %v2783_v43  ;;  %4029 = vst [vmem:[#allocation34_spill] sm:$0xff] %v3072_v30 }
  0xa6   : > { %4002 = vst [vmem:[#allocation7_spill] sm:$0xff] %v2703_v31  ;;  %695 = vmatpush.msra.mxu3 %v2703_v31  ;;  %v2759_v40 = vpack.i.bf16 0.0, %v2703_v31  ;;  %v2391_v44 = vpack.i.bf16 %v2703_v31, %v2688_v27  ;;  %750 = vmatpush.msrb.mxu2 %v2842_v52  ;;  %v3091_v27 = vld [vmem:[%s3888_s2 + $0x1a8] sm:$0xff]  ;;  %v3118_v31 = vld [vmem:[%s3888_s2 + $0x198] sm:$0xff] }
  0xa7   : > { %2256 = vmatmul.msk.f32.gmra.mxu2 %vm604_vm1, %v591_v28  ;;  %2257 = vmatmul.msk.f32.vlgmr.msra.gmra.mxu3 %vm604_vm1, %v590_v20  ;;  %v3030_v20 = vld [vmem:[%s3888_s2 + $0x128] sm:$0xff]  ;;  %4032 = vst [vmem:[#allocation37_spill] sm:$0xff] %v3091_v27 }
  0xa8   : > { %4004 = vst [vmem:[#allocation9_spill] sm:$0xff] %v2759_v40  ;;  %708 = vmatpush.msra.mxu0 %v2804_v45  ;;  %731 = vmatpush.msra.mxu1 %v2809_v46 }
  0xa9   : > { %2377 = vrot.lane.b32.xlu0 %v2710_v32, %s2561_s14  ;;  %751 = vmatpush.msrb.mxu2 %v2849_v53  ;;  %4023 = vst [vmem:[#allocation28_spill] sm:$0xff] %v3030_v20 }
  0xaa   : > { %2362 = vrot.lane.b32.xlu1 %v2710_v32, %s2562_s15  ;;  %2367 = vrot.lane.b32.xlu2 %v2710_v32, %s2557_s25  ;;  %4036 = vst [vmem:[#allocation41_spill] sm:$0xff] %v3118_v31 }
  0xab   : > { %709 = vmatpush.msra.mxu0 %v2814_v47  ;;  %732 = vmatpush.msra.mxu1 %v2821_v48 }
  0xac   : > { %752 = vmatpush.msrb.mxu2 %v2880_v58  ;;  %772 = vmatpush.msrb.mxu3 %v2903_v62 }
  0xad   : > { %710 = vmatpush.msra.mxu0 %v2832_v50  ;;  %733 = vmatpush.msra.mxu1 %v2837_v51 }
  0xae   : > { %753 = vmatpush.msrb.mxu2 %v2897_v61  ;;  %773 = vmatpush.msrb.mxu3 %v2925_v2 }
  0xaf   : > { %2258 = vmatmul.msk.f32.gmra.mxu3 %vm604_vm1, %v591_v28  ;;  %711 = vmatpush.msra.mxu0 %v2855_v54  ;;  %v3058_v28 = vld [vmem:[%s3888_s2 + $0x118] sm:$0xff]  ;;  %vm1862_vm1 = vcmask 900096  }
  0xb0   : > { %734 = vmatpush.msra.mxu1 %v2860_v55  ;;  %754 = vmatpush.msrb.mxu2 %v2920_v1  ;;  %4027 = vst [vmem:[#allocation32_spill] sm:$0xff] %v3058_v28 }
  0xb1   : > { %2397 = vrot.lane.b32.xlu0 %v2759_v40, %s2557_s25  ;;  %712 = vmatpush.msra.mxu0 %v2870_v56 }
  0xb2   : > { %2372 = vrot.lane.b32.xlu1 %v2710_v32, %s2556_s24  ;;  %2382 = vrot.lane.b32.xlu2 %v2710_v32, %s2560_s13 }
  0xb3   : > { %735 = vmatpush.msra.mxu1 %v2875_v57  ;;  %713 = vmatpush.msra.mxu0 %v2887_v59 }
  0xb4   : > { %755 = vmatpush.msrb.mxu2 %v2944_v5  ;;  %774 = vmatpush.msrb.mxu3 %v2949_v6 }
  0xb5   : > { %736 = vmatpush.msra.mxu1 %v2892_v60  ;;  %714 = vmatpush.msra.mxu0 %v2908_v63 }
  0xb6   : > { %756 = vmatpush.msrb.mxu2 %v2970_v9  ;;  %775 = vmatpush.msrb.mxu3 %v2977_v10 }
  0xb7   : > { %737 = vmatpush.msra.mxu1 %v2913_v0  ;;  %715 = vmatpush.msra.mxu0 %v2932_v3 }
  0xb8   : > { %757 = vmatpush.msrb.mxu2 %v2994_v13  ;;  %776 = vmatpush.msrb.mxu3 %v2999_v14 }
  0xb9   : > { %2412 = vrot.lane.b32.xlu0 %v2759_v40, %s2560_s13  ;;  %738 = vmatpush.msra.mxu1 %v2937_v4 }
  0xba   : > { %2387 = vrot.lane.b32.xlu1 %v2710_v32, %s2559_s30  ;;  %2392 = vrot.lane.b32.xlu2 %v2391_v44, %s2558_s26  ;;  %v3077_v44 = vld [vmem:[%s3888_s2 + $0x1b0] sm:$0xff] }
  0xbb   : > { %716 = vmatpush.msra.mxu0 %v2960_v7  ;;  %739 = vmatpush.msra.mxu1 %v2965_v8  ;;  %4030 = vst [vmem:[#allocation35_spill] sm:$0xff] %v3077_v44  ;;  %v3127_v32 = vld [vmem:[%s3888_s2 + $0x190] sm:$0xff] }
  0xbc   : > { %758 = vmatpush.msrb.mxu2 %v3016_v17  ;;  %777 = vmatpush.msrb.mxu3 %v3021_v18  ;;  %4037 = vst [vmem:[#allocation42_spill] sm:$0xff] %v3127_v32 }
  0xbd   : > { %717 = vmatpush.msra.mxu0 %v2982_v11  ;;  %740 = vmatpush.msra.mxu1 %v2987_v12 }
  0xbe   : > { %759 = vmatpush.msrb.mxu2 %v3030_v20  ;;  %778 = vmatpush.msrb.mxu3 %v3035_v24 }
  0xbf   : > { %718 = vmatpush.msra.mxu0 %v3004_v15  ;;  %741 = vmatpush.msra.mxu1 %v3011_v16 }
  0xc0   : > { %760 = vmatpush.msrb.mxu2 %v3046_v25  ;;  %779 = vmatpush.msrb.mxu3 %v3051_v26 }
  0xc1   : > { %805 = vmatpush.msrb.mxu0 %v2721_v33  ;;  %828 = vmatpush.msrb.mxu1 %v2726_v34 }
  0xc2   : > { %2407 = vrot.lane.b32.xlu1 %v2759_v40, %s2561_s14  ;;  %2402 = vrot.lane.b32.xlu2 %v2759_v40, %s2556_s24 }
  0xc3   : > { %829 = vmatpush.msrb.mxu1 %v2738_v36  ;;  %806 = vmatpush.msrb.mxu0 %v2733_v35 }
  0xc4   : > { %761 = vmatpush.msrb.mxu2 %v3058_v28  ;;  %780 = vmatpush.msrb.mxu3 %v3063_v29 }
  0xc5   : > { %807 = vmatpush.msrb.mxu0 %v2743_v37  ;;  %830 = vmatpush.msrb.mxu1 %v2750_v38 }
  0xc6   : > { %762 = vmatpush.msrb.mxu2 %v3072_v30  ;;  %781 = vmatpush.msrb.mxu3 %v3077_v44 }
  0xc7   : > { %808 = vmatpush.msrb.mxu0 %v2755_v39  ;;  %831 = vmatpush.msrb.mxu1 %v2766_v41 }
  0xc8   : > { %763 = vmatpush.msrb.mxu2 %v3086_v22  ;;  %782 = vmatpush.msrb.mxu3 %v3091_v27 }
  0xc9   : > { %809 = vmatpush.msrb.mxu0 %v2771_v42  ;;  %832 = vmatpush.msrb.mxu1 %v2783_v43 }
  0xca   : > { %2417 = vrot.lane.b32.xlu2 %v2759_v40, %s2559_s30  ;;  %v3109_v40 = vld [vmem:[%s3888_s2 + $0x1a0] sm:$0xff]  ;;  %764 = vmatpush.msrb.mxu2 %v3104_v19 }
  0xcb   : > { %4035 = vst [vmem:[#allocation40_spill] sm:$0xff] %v3109_v40  ;;  %833 = vmatpush.msrb.mxu1 %v2809_v46  ;;  %810 = vmatpush.msrb.mxu0 %v2804_v45 }
  0xcc   : > { %783 = vmatpush.msrb.mxu3 %v3109_v40  ;;  %851 = vmatpush.msra.mxu2 %v2826_v49 }
  0xcd   : > { %811 = vmatpush.msrb.mxu0 %v2814_v47  ;;  %834 = vmatpush.msrb.mxu1 %v2821_v48 }
  0xce   : > { %784 = vmatpush.msrb.mxu3 %v3118_v31  ;;  %852 = vmatpush.msra.mxu2 %v2842_v52 }
  0xcf   : > { %812 = vmatpush.msrb.mxu0 %v2832_v50  ;;  %835 = vmatpush.msrb.mxu1 %v2837_v51  ;;  %v3147_v51 = vld [vmem:[%s3888_s2 + $0x180] sm:$0xff] }
  0xd0   : > { %785 = vmatpush.msrb.mxu3 %v3127_v32  ;;  %853 = vmatpush.msra.mxu2 %v2849_v53  ;;  %4040 = vst [vmem:[#allocation45_spill] sm:$0xff] %v3147_v51 }
  0xd1   : > { %813 = vmatpush.msrb.mxu0 %v2855_v54  ;;  %836 = vmatpush.msrb.mxu1 %v2860_v55 }
  0xd2   : > { %786 = vmatpush.msrb.mxu3 %v3134_v23  ;;  %854 = vmatpush.msra.mxu2 %v2880_v58 }
  0xd3   : > { %837 = vmatpush.msrb.mxu1 %v2875_v57  ;;  %814 = vmatpush.msrb.mxu0 %v2870_v56 }
  0xd4   : > { %787 = vmatpush.msrb.mxu3 %v3147_v51  ;;  %855 = vmatpush.msra.mxu2 %v2897_v61 }
  0xd5   : > { %815 = vmatpush.msrb.mxu0 %v2887_v59  ;;  %838 = vmatpush.msrb.mxu1 %v2892_v60 }
  0xd6   : > { %874 = vmatpush.msra.mxu3 %v2903_v62  ;;  %856 = vmatpush.msra.mxu2 %v2920_v1 }
  0xd7   : > { %816 = vmatpush.msrb.mxu0 %v2908_v63  ;;  %839 = vmatpush.msrb.mxu1 %v2913_v0 }
  0xd8   : > { %875 = vmatpush.msra.mxu3 %v2925_v2  ;;  %857 = vmatpush.msra.mxu2 %v2944_v5 }
  0xd9   : > { %817 = vmatpush.msrb.mxu0 %v2932_v3  ;;  %840 = vmatpush.msrb.mxu1 %v2937_v4 }
  0xda   : > { %876 = vmatpush.msra.mxu3 %v2949_v6  ;;  %858 = vmatpush.msra.mxu2 %v2970_v9 }
  0xdb   : > { %841 = vmatpush.msrb.mxu1 %v2965_v8  ;;  %818 = vmatpush.msrb.mxu0 %v2960_v7 }
  0xdc   : > { %877 = vmatpush.msra.mxu3 %v2977_v10  ;;  %859 = vmatpush.msra.mxu2 %v2994_v13 }
  0xdd   : > { %819 = vmatpush.msrb.mxu0 %v2982_v11  ;;  %842 = vmatpush.msrb.mxu1 %v2987_v12 }
  0xde   : > { %878 = vmatpush.msra.mxu3 %v2999_v14  ;;  %860 = vmatpush.msra.mxu2 %v3016_v17 }
  0xdf   : > { %820 = vmatpush.msrb.mxu0 %v3004_v15  ;;  %843 = vmatpush.msrb.mxu1 %v3011_v16 }
  0xe0   : > { %879 = vmatpush.msra.mxu3 %v3021_v18  ;;  %861 = vmatpush.msra.mxu2 %v3030_v20 }
  0xe2   : > { %880 = vmatpush.msra.mxu3 %v3035_v24  ;;  %862 = vmatpush.msra.mxu2 %v3046_v25 }
  0xe4   : > { %881 = vmatpush.msra.mxu3 %v3051_v26  ;;  %863 = vmatpush.msra.mxu2 %v3058_v28 }
  0xe6   : > { %882 = vmatpush.msra.mxu3 %v3063_v29  ;;  %864 = vmatpush.msra.mxu2 %v3072_v30 }
  0xe8   : > { %883 = vmatpush.msra.mxu3 %v3077_v44  ;;  %865 = vmatpush.msra.mxu2 %v3086_v22 }
  0xea   : > { %884 = vmatpush.msra.mxu3 %v3091_v27  ;;  %866 = vmatpush.msra.mxu2 %v3104_v19 }
  0xec   : > { %885 = vmatpush.msra.mxu3 %v3109_v40 }
  0xee   : > { %886 = vmatpush.msra.mxu3 %v3118_v31 }
  0xf0   : > { %887 = vmatpush.msra.mxu3 %v3127_v32 }
  0xf2   : > { %888 = vmatpush.msra.mxu3 %v3134_v23 }
  0xf4   : > { %v3095_v21 = vpop.permute.xlu2 %2332  ;;  %889 = vmatpush.msra.mxu3 %v3147_v51 }
  0xf5   : > { %4033 = vst [vmem:[#allocation38_spill] sm:$0xff] %v3095_v21 }
  0xfc   : > { %v3138_v48 = vpop.permute.xlu2 %2347 }
  0xfd   : > { %4039 = vst [vmem:[#allocation44_spill] sm:$0xff] %v3138_v48  ;;  %v3159_v48 = vpop.permute.xlu0 %596 }
 0x104   : > { %v3163_v57 = vpop.permute.xlu2 %2367 }
 0x105   : > { %4041 = vst [vmem:[#allocation46_spill] sm:$0xff] %v3163_v57 }
 0x10b   : > { %v3179_v4 = vpop.permute.xlu0 %2342 }
 0x10c   : > { %4042 = vst [vmem:[#allocation47_spill] sm:$0xff] %v3179_v4  ;;  %v3183_v8 = vpop.permute.xlu2 %2382 }
 0x10d   : > { %4043 = vst [vmem:[#allocation48_spill] sm:$0xff] %v3183_v8  ;;  %v3945_v8 = vunpack.i.h.bf16 %v3095_v21 }
 0x113   : > { %v3191_v16 = vpop.permute.xlu0 %2357 }
 0x114   : > { %4044 = vst [vmem:[#allocation49_spill] sm:$0xff] %v3191_v16  ;;  %v3195_v4 = vpop.permute.xlu2 %2392 }
 0x115   : > { %4045 = vst [vmem:[#allocation50_spill] sm:$0xff] %v3195_v4  ;;  %v3944_v15 = vunpack.i.l.bf16 %v3195_v4  ;;  %v628_v12 = vpop.f32.mrf.mxu0 }
 0x116   : > { %v3202_v28 = vadd.f32 %v628_v12, %v3159_v48  ;;  %v651_v25 = vpop.f32.mrf.mxu1 }
 0x117   : > { %v3205_v16 = vadd.f32 %v651_v25, %v3159_v48  ;;  %v3214_v22 = vsel %vm1714_vm2, %v3945_v8, %v3944_v15  ;;  %v602_v25 = vpop.permute.xlu1 %601 }
 0x118   : > { %4046 = vst [vmem:[#allocation51_spill] sm:$0xff] %v3214_v22  ;;  %719 = vmatmul.f32.vlgmr.msra.gmra.mxu0 %v3202_v28 }
 0x119   : > { %742 = vmatmul.f32.vlgmr.msra.gmra.mxu1 %v3205_v16 }
 0x11b   : > { %v3219_v12 = vpop.permute.xlu0 %2377 }
 0x11c   : > { %4047 = vst [vmem:[#allocation52_spill] sm:$0xff] %v3219_v12  ;;  %v3960_v12 = vunpack.i.h.bf16 %v3163_v57 }
 0x11d   : > { %v631_v19 = vpop.f32.mrf.mxu0 }
 0x11e   : > { %v3223_v4 = vadd.f32 %v631_v19, %v602_v25  ;;  %v654_v21 = vpop.f32.mrf.mxu1 }
 0x11f   : > { %v3225_v30 = vadd.f32 %v654_v21, %v602_v25  ;;  %v797_v21 = vmul.f32 %v3202_v28, %v3202_v28 }
 0x120   : > { %722 = vmatmul.f32.gmra.mxu0 %v3223_v4 }
 0x121   : > { %745 = vmatmul.f32.gmra.mxu1 %v3225_v30 }
 0x122   : > { %v674_v15 = vpop.f32.mrf.mxu2 }
 0x123   : > { %v3231_v8 = vadd.f32 %v674_v15, %v3159_v48  ;;  %v3233_v22 = vpop.permute.xlu0 %2397  ;;  %v798_v15 = vmul.f32 %v3205_v16, %v3205_v16 }
 0x124   : > { %4048 = vst [vmem:[#allocation53_spill] sm:$0xff] %v3233_v22  ;;  %v3959_v19 = vunpack.i.l.bf16 %v3233_v22  ;;  %v801_v22 = vmul.f32 %v3223_v4, %v3223_v4 }
 0x125   : > { %765 = vmatmul.f32.vlgmr.msrb.gmra.mxu2 %v3231_v8 }
 0x126   : > { %v3245_v51 = vsel %vm1936_vm3, %v3960_v12, %v3959_v19  ;;  %v802_v19 = vmul.f32 %v3225_v30, %v3225_v30 }
 0x127   : > { %4049 = vst [vmem:[#allocation54_spill] sm:$0xff] %v3245_v51 }
 0x128   : > { %821 = vmatmul.f32.vlgmr.msrb.gmra.mxu0 %v797_v21 }
 0x129   : > { %844 = vmatmul.f32.vlgmr.msrb.gmra.mxu1 %v798_v15 }
 0x12a   : > { %v677_v23 = vpop.f32.mrf.mxu2  ;;  %v697_v32 = vpop.f32.mrf.mxu3 }
 0x12b   : > { %v3249_v31 = vadd.f32 %v677_v23, %v602_v25  ;;  %v3252_v40 = vadd.f32 %v697_v32, %v3159_v48  ;;  %v799_v23 = vmul.f32 %v3231_v8, %v3231_v8 }
 0x12d   : > { %768 = vmatmul.f32.gmra.mxu2 %v3249_v31  ;;  %788 = vmatmul.f32.vlgmr.msrb.gmra.mxu3 %v3252_v40  ;;  %v800_v32 = vmul.f32 %v3252_v40, %v3252_v40  ;;  %v803_v48 = vmul.f32 %v3249_v31, %v3249_v31 }
 0x130   : > { %824 = vmatmul.f32.gmra.mxu0 %v801_v22 }
 0x131   : > { %847 = vmatmul.f32.gmra.mxu1 %v802_v19 }
 0x132   : > { %v700_v21 = vpop.f32.mrf.mxu3 }
 0x133   : > { %v3262_v15 = vadd.f32 %v700_v21, %v602_v25 }
 0x135   : > { %791 = vmatmul.f32.gmra.mxu3 %v3262_v15  ;;  %867 = vmatmul.f32.vlgmr.msra.gmra.mxu2 %v799_v23  ;;  %v804_v22 = vmul.f32 %v3262_v15, %v3262_v15  ;;  %v3274_v23 = vld [vmem:[%s3889_s3] sm:$0xff] }
 0x136   : > { %4050 = vst [vmem:[#allocation55_spill] sm:$0xff] %v3274_v23 }
 0x137   : > { %932 = vst [vmem:[#allocation1] ss:$4 sm:$0xff] %v3274_v23 }
 0x13d   : > { %870 = vmatmul.f32.gmra.mxu2 %v803_v48  ;;  %890 = vmatmul.f32.vlgmr.msra.gmra.mxu3 %v800_v32 }
 0x13e   : > { %v933_v17 = vld.sshfl [vmem:[#allocation1] sm:$0xff pattern:$0x73625140]  ;;  %v934_v13 = vld.sshfl [vmem:[#allocation1 + $0x8] sm:$0xff pattern:$0x73625140] }
 0x13f   : > { %2259 = vmatpush.msk.msra.mxu0 %vm944_vm4, %v933_v17  ;;  %v935_v0 = vld.sshfl [vmem:[#allocation1 + $0x10] sm:$0xff pattern:$0x73625140]  ;;  %2262 = vmatpush.msk.msra.mxu1 %vm944_vm4, %v934_v13  ;;  %v936_v63 = vld.sshfl [vmem:[#allocation1 + $0x18] sm:$0xff pattern:$0x73625140] }
 0x140   : > { %2265 = vmatpush.msk.msrb.mxu2 %vm944_vm4, %v935_v0  ;;  %2268 = vmatpush.msk.msrb.mxu3 %vm944_vm4, %v936_v63  ;;  %1053 = vst [vmem:[#allocation1] ss:$4 sm:$0xff] %v3274_v23 }
 0x145   : > { %893 = vmatmul.f32.gmra.mxu3 %v804_v22 }
 0x147   : > { %v1055_v26 = vld.sshfl [vmem:[#allocation1 + $0x8] sm:$0xff pattern:$0x73625140] }
 0x148   : > { %2274 = vmatpush.msk.msrb.mxu1 %vm944_vm4, %v1055_v26 }
 0x195   : > { %v720_v19 = vpop.f32.mrf.mxu0 }
 0x196   : > { %v743_v12 = vpop.f32.mrf.mxu1 }
 0x197   : > { %v744_v48 = vadd.f32 %v743_v12, %v720_v19 }
 0x19d   : > { %v723_v25 = vpop.f32.mrf.mxu0 }
 0x19e   : > { %v746_v21 = vpop.f32.mrf.mxu1 }
 0x19f   : > { %v747_v3 = vadd.f32 %v746_v21, %v723_v25 }
 0x1a5   : > { %v822_v27 = vpop.f32.mrf.mxu0 }
 0x1a6   : > { %v845_v7 = vpop.f32.mrf.mxu1 }
 0x1a7   : > { %v846_v29 = vadd.f32 %v845_v7, %v822_v27 }
 0x1a8   : > { %v766_v51 = vpop.f32.mrf.mxu2 }
 0x1a9   : > { %v767_v20 = vadd.f32 %v766_v51, %v744_v48 }
 0x1ad   : > { %v825_v27 = vpop.f32.mrf.mxu0 }
 0x1ae   : > { %v848_v7 = vpop.f32.mrf.mxu1 }
 0x1af   : > { %v849_v0 = vadd.f32 %v848_v7, %v825_v27 }
 0x1b0   : > { %v769_v57 = vpop.f32.mrf.mxu2  ;;  %v789_v11 = vpop.f32.mrf.mxu3 }
 0x1b1   : > { %v790_v44 = vadd.f32 %v789_v11, %v767_v20  ;;  %v770_v11 = vadd.f32 %v769_v57, %v747_v3  ;;  %v1056_v57 = vld.sshfl [vmem:[#allocation1 + $0x10] sm:$0xff pattern:$0x73625140] }
 0x1b2   : > { %2277 = vmatpush.msk.msra.mxu2 %vm944_vm4, %v1056_v57 }
 0x1b3   : > { %v3280_v12 = vmul.f32 0.00390625, %v790_v44  ;;  %v1054_v44 = vld.sshfl [vmem:[#allocation1] sm:$0xff pattern:$0x73625140] }
 0x1b4   : > { %2271 = vmatpush.msk.msrb.mxu0 %vm944_vm4, %v1054_v44  ;;  %v584_v44 = vld [vmem:[%s3295_s23] sm:$0xff] }
 0x1b5   : > { %v899_v17 = vmul.f32 %v3280_v12, %v3280_v12 }
 0x1b8   : > { %v792_v32 = vpop.f32.mrf.mxu3  ;;  %v868_v22 = vpop.f32.mrf.mxu2 }
 0x1b9   : > { %v869_v19 = vadd.f32 %v868_v22, %v846_v29  ;;  %v793_v25 = vadd.f32 %v792_v32, %v770_v11 }
 0x1bb   : > { %v796_v29 = vmul.f32 0.00390625, %v793_v25 }
 0x1c0   : > { %v891_v51 = vpop.f32.mrf.mxu3  ;;  %v871_v21 = vpop.f32.mrf.mxu2 }
 0x1c1   : > { %v892_v20 = vadd.f32 %v891_v51, %v869_v19  ;;  %v872_v22 = vadd.f32 %v871_v21, %v849_v0  ;;  %v1057_v19 = vld.sshfl [vmem:[#allocation1 + $0x18] sm:$0xff pattern:$0x73625140]  ;;  %v900_v51 = vmul.f32 %v796_v29, %v796_v29 }
 0x1c2   : > { %2280 = vmatpush.msk.msra.mxu3 %vm944_vm4, %v1057_v19  ;;  %1452 = vst [vmem:[#allocation1] ss:$4 sm:$0xff] %v3274_v23 }
 0x1c3   : > { %v897_v13 = vmul.f32 0.00390625, %v892_v20 }
 0x1c5   : > { %v901_v48 = vsub.f32 %v897_v13, %v899_v17 }
 0x1c7   : > { %v903_v63 = vadd.f32 1e-05, %v901_v48 }
 0x1c8   : > { %v894_v3 = vpop.f32.mrf.mxu3 }
 0x1c9   : > { %2532 = vrsqrt.f32 %v903_v63  ;;  %v895_v32 = vadd.f32 %v894_v3, %v872_v22  ;;  %vm911_vm6 = vweird.f32 %v903_v63 }
 0x1cb   : > { %v898_v11 = vmul.f32 0.00390625, %v895_v32 }
 0x1cd   : > { %v902_v20 = vsub.f32 %v898_v11, %v900_v51  ;;  %v585_v51 = vld [vmem:[%s3295_s23 + $0x8] sm:$0xff] }
 0x1cf   : > { %v2533_v27 = vpop.eup %2532  ;;  %v904_v7 = vadd.f32 1e-05, %v902_v20 }
 0x1d0   : > { %v906_v17 = vmul.f32 %v2533_v27, %v903_v63  ;;  %vm912_vm5 = vweird.f32 %v2533_v27 }
 0x1d1   : > { %2534 = vrsqrt.f32 %v904_v7  ;;  %vm913_vm7 = vmor %vm911_vm6, %vm912_vm5  ;;  %vm921_vm10 = vweird.f32 %v904_v7  ;;  %vm1788_vm5 = vcmask 916480   ;;  %vm1973_vm6 = vcmask 769024  }
 0x1d2   : > { %v907_v26 = vmul.f32 %v2533_v27, %v906_v17  ;;  %v586_v17 = vld [vmem:[%s3295_s23 + $0x10] sm:$0xff] }
 0x1d4   : > { %v908_v25 = vmul.f32 0.5, %v907_v26 }
 0x1d6   : > { %v909_v13 = vsub.f32 1.5, %v908_v25  ;;  %v587_v25 = vld [vmem:[%s3295_s23 + $0x18] sm:$0xff] }
 0x1d7   : > { %v2535_v21 = vpop.eup %2534 }
 0x1d8   : > { %v910_v0 = vmul.f32 %v2533_v27, %v909_v13  ;;  %v916_v48 = vmul.f32 %v2535_v21, %v904_v7  ;;  %vm922_vm9 = vweird.f32 %v2535_v21 }
 0x1d9   : > { %vm923_vm11 = vmor %vm921_vm10, %vm922_vm9 }
 0x1da   : > { %v914_v22 = vsel %vm913_vm7, %v2533_v27, %v910_v0  ;;  %v917_v57 = vmul.f32 %v2535_v21, %v916_v48  ;;  %vm1751_vm7 = vcmask 1031168  }
 0x1db   : > { %v925_v3 = vmul.f32 %v914_v22, %v584_v44 }
 0x1dc   : > { %v918_v19 = vmul.f32 0.5, %v917_v57 }
 0x1dd   : > { %2260 = vmatmul.msk.f32.vlgmr.msra.gmra.mxu0 %vm937_vm8, %v925_v3  ;;  %2263 = vmatmul.msk.f32.vlgmr.msra.gmra.mxu1 %vm937_vm8, %v925_v3  ;;  %v927_v27 = vmul.f32 %v925_v3, %v3280_v12 }
 0x1de   : > { %v919_v32 = vsub.f32 1.5, %v918_v19  ;;  %2266 = vmatmul.msk.f32.vlgmr.msrb.gmra.mxu2 %vm937_vm8, %v925_v3  ;;  %2269 = vmatmul.msk.f32.vlgmr.msrb.gmra.mxu3 %vm937_vm8, %v925_v3 }
 0x1df   : > { %v929_v26 = vsub.f32 %v586_v17, %v927_v27 }
 0x1e0   : > { %v920_v63 = vmul.f32 %v2535_v21, %v919_v32 }
 0x1e2   : > { %v924_v11 = vsel %vm923_vm11, %v2535_v21, %v920_v63 }
 0x1e3   : > { %v926_v20 = vmul.f32 %v924_v11, %v585_v51 }
 0x1e5   : > { %2261 = vmatmul.msk.f32.gmra.mxu0 %vm937_vm8, %v926_v20  ;;  %2264 = vmatmul.msk.f32.gmra.mxu1 %vm937_vm8, %v926_v20  ;;  %v928_v7 = vmul.f32 %v926_v20, %v796_v29 }
 0x1e6   : > { %2267 = vmatmul.msk.f32.gmra.mxu2 %vm937_vm8, %v926_v20  ;;  %2270 = vmatmul.msk.f32.gmra.mxu3 %vm937_vm8, %v926_v20 }
 0x1e7   : > { %v930_v13 = vsub.f32 %v587_v25, %v928_v7 }
 0x1ed   : > { %2272 = vmatmul.msk.f32.vlgmr.msrb.gmra.mxu0 %vm937_vm8, %v929_v26  ;;  %2275 = vmatmul.msk.f32.vlgmr.msrb.gmra.mxu1 %vm937_vm8, %v929_v26 }
 0x1ee   : > { %2278 = vmatmul.msk.f32.vlgmr.msra.gmra.mxu2 %vm937_vm8, %v929_v26  ;;  %2281 = vmatmul.msk.f32.vlgmr.msra.gmra.mxu3 %vm937_vm8, %v929_v26 }
 0x1f5   : > { %2273 = vmatmul.msk.f32.gmra.mxu0 %vm937_vm8, %v930_v13  ;;  %2276 = vmatmul.msk.f32.gmra.mxu1 %vm937_vm8, %v930_v13 }
 0x1f6   : > { %2279 = vmatmul.msk.f32.gmra.mxu2 %vm937_vm8, %v930_v13  ;;  %2282 = vmatmul.msk.f32.gmra.mxu3 %vm937_vm8, %v930_v13 }
 0x25a   : > { %v970_v12 = vpop.f32.mrf.mxu0  ;;  %v993_v21 = vpop.f32.mrf.mxu1 }
 0x25b   : > { %v1045_v32 = vmul.f32 %v970_v12, %v3202_v28  ;;  %v1046_v63 = vmul.f32 %v993_v21, %v3205_v16 }
 0x261   : > { %v1016_v0 = vpop.f32.mrf.mxu2  ;;  %v1039_v48 = vpop.f32.mrf.mxu3 }
 0x262   : > { %v973_v44 = vpop.f32.mrf.mxu0  ;;  %v996_v22 = vpop.f32.mrf.mxu1  ;;  %v1047_v59 = vmul.f32 %v1016_v0, %v3231_v8  ;;  %v1048_v16 = vmul.f32 %v1039_v48, %v3252_v40  ;;  %v4054_v48 = vld [vmem:[#allocation29_spill] sm:$0xff] }
 0x263   : > { %v1049_v51 = vmul.f32 %v973_v44, %v3223_v4  ;;  %v1050_v11 = vmul.f32 %v996_v22, %v3225_v30  ;;  %v1180_v4 = vld [vmem:[%s3894_s8] sm:$0xff] }
 0x269   : > { %v1019_v57 = vpop.f32.mrf.mxu2  ;;  %v1042_v3 = vpop.f32.mrf.mxu3 }
 0x26a   : > { %v1089_v19 = vpop.f32.mrf.mxu0  ;;  %v1112_v29 = vpop.f32.mrf.mxu1  ;;  %v1051_v30 = vmul.f32 %v1019_v57, %v3249_v31  ;;  %v1052_v12 = vmul.f32 %v1042_v3, %v3262_v15  ;;  %v4053_v15 = vld [vmem:[#allocation12_spill] sm:$0xff]  ;;  %v4055_v57 = vld [vmem:[#allocation13_spill] sm:$0xff]  ;;  %v4056_v3 = vld [vmem:[#allocation14_spill] sm:$0xff] }
 0x26b   : > { %v1164_v7 = vadd.f32 %v1089_v19, %v1045_v32  ;;  %v1165_v25 = vadd.f32 %v1112_v29, %v1046_v63  ;;  %v4057_v19 = vld [vmem:[#allocation21_spill] sm:$0xff]  ;;  %v4058_v29 = vld [vmem:[#allocation31_spill] sm:$0xff]  ;;  %v4060_v63 = vld [vmem:[#allocation16_spill] sm:$0xff] }
 0x26c   : > { %v4059_v32 = vld [vmem:[#allocation15_spill] sm:$0xff] }
 0x26d   : > { %v1172_v24 = vmax.f32 %v1164_v7, 0.0  ;;  %v1173_v28 = vmax.f32 %v1165_v25, 0.0  ;;  %v4067_v7 = vld [vmem:[#allocation19_spill] sm:$0xff]  ;;  %v4068_v25 = vld [vmem:[#allocation20_spill] sm:$0xff] }
 0x271   : > { %v1135_v20 = vpop.f32.mrf.mxu2  ;;  %v1158_v27 = vpop.f32.mrf.mxu3 }
 0x272   : > { %v1092_v17 = vpop.f32.mrf.mxu0  ;;  %v1115_v26 = vpop.f32.mrf.mxu1  ;;  %v1166_v21 = vadd.f32 %v1135_v20, %v1047_v59  ;;  %v1167_v8 = vadd.f32 %v1158_v27, %v1048_v16  ;;  %v4063_v20 = vld [vmem:[#allocation17_spill] sm:$0xff]  ;;  %v4064_v27 = vld [vmem:[#allocation18_spill] sm:$0xff]  ;;  %v4072_v16 = vld [vmem:[#allocation23_spill] sm:$0xff] }
 0x273   : > { %v1168_v13 = vadd.f32 %v1092_v17, %v1049_v51  ;;  %v1169_v23 = vadd.f32 %v1115_v26, %v1050_v11  ;;  %v4061_v51 = vld [vmem:[#allocation24_spill] sm:$0xff]  ;;  %v4062_v11 = vld [vmem:[#allocation33_spill] sm:$0xff]  ;;  %v4065_v17 = vld [vmem:[#allocation27_spill] sm:$0xff] }
 0x274   : > { %v1174_v59 = vmax.f32 %v1166_v21, 0.0  ;;  %v4066_v26 = vld [vmem:[#allocation35_spill] sm:$0xff]  ;;  %v4075_v21 = vld [vmem:[#allocation25_spill] sm:$0xff] }
 0x275   : > { %v1176_v9 = vmax.f32 %v1168_v13, 0.0  ;;  %v1177_v60 = vmax.f32 %v1169_v23, 0.0  ;;  %v4069_v13 = vld [vmem:[#allocation28_spill] sm:$0xff] }
 0x277   : > { %1204 = vmatpush.msra.mxu0 %v1176_v9  ;;  %1224 = vmatpush.msra.mxu1 %v1177_v60  ;;  %v1175_v60 = vmax.f32 %v1167_v8, 0.0  ;;  %v4051_v9 = vld [vmem:[#allocation10_spill] sm:$0xff]  ;;  %v4078_v8 = vld [vmem:[#allocation41_spill] sm:$0xff] }
 0x279   : > { %v1138_v44 = vpop.f32.mrf.mxu2  ;;  %v1161_v22 = vpop.f32.mrf.mxu3  ;;  %1205 = vmatpush.msra.mxu0 %v1172_v24  ;;  %1225 = vmatpush.msra.mxu1 %v1173_v28  ;;  %v4052_v24 = vld [vmem:[#allocation11_spill] sm:$0xff]  ;;  %v4070_v28 = vld [vmem:[#allocation37_spill] sm:$0xff] }
 0x27a   : > { %v1170_v23 = vadd.f32 %v1138_v44, %v1051_v30  ;;  %v1171_v0 = vadd.f32 %v1161_v22, %v1052_v12  ;;  %2283 = vmatmul.msk.f32.vlgmr.msra.gmra.mxu0 %vm494_vm0, %v1180_v4  ;;  %2284 = vmatmul.msk.f32.vlgmr.msra.gmra.mxu1 %vm494_vm0, %v1180_v4  ;;  %v4073_v30 = vld [vmem:[#allocation30_spill] sm:$0xff]  ;;  %v4074_v12 = vld [vmem:[#allocation40_spill] sm:$0xff] }
 0x27b   : > { %1270 = vmatpush.msrb.mxu0 %v2721_v33  ;;  %1290 = vmatpush.msrb.mxu1 %v2726_v34  ;;  %v4076_v44 = vld [vmem:[#allocation26_spill] sm:$0xff]  ;;  %v4077_v22 = vld [vmem:[#allocation32_spill] sm:$0xff] }
 0x27c   : > { %v1178_v40 = vmax.f32 %v1170_v23, 0.0  ;;  %v1179_v31 = vmax.f32 %v1171_v0, 0.0  ;;  %v4079_v23 = vld [vmem:[#allocation34_spill] sm:$0xff] }
 0x27d   : > { %1271 = vmatpush.msrb.mxu0 %v2733_v35  ;;  %1291 = vmatpush.msrb.mxu1 %v2738_v36  ;;  %v4080_v0 = vld [vmem:[#allocation42_spill] sm:$0xff] }
 0x27e   : > { %1244 = vmatpush.msrb.mxu2 %v1178_v40  ;;  %1264 = vmatpush.msrb.mxu3 %v1179_v31  ;;  %v4081_v40 = vld [vmem:[#allocation36_spill] sm:$0xff]  ;;  %v4085_v31 = vld [vmem:[#allocation55_spill] sm:$0xff] }
 0x27f   : > { %1272 = vmatpush.msrb.mxu0 %v2743_v37  ;;  %1292 = vmatpush.msrb.mxu1 %v2750_v38 }
 0x280   : > { %1245 = vmatpush.msrb.mxu2 %v1174_v59  ;;  %1265 = vmatpush.msrb.mxu3 %v1175_v60 }
 0x281   : > { %2285 = vmatmul.msk.f32.vlgmr.msrb.gmra.mxu2 %vm494_vm0, %v1180_v4  ;;  %2286 = vmatmul.msk.f32.vlgmr.msrb.gmra.mxu3 %vm494_vm0, %v1180_v4  ;;  %v4071_v4 = vld [vmem:[#allocation22_spill] sm:$0xff] }
 0x282   : > { %1273 = vmatpush.msrb.mxu0 %v2755_v39  ;;  %1293 = vmatpush.msrb.mxu1 %v2766_v41 }
 0x283   : > { %1310 = vmatpush.msra.mxu2 %v2826_v49  ;;  %1330 = vmatpush.msra.mxu3 %v2903_v62 }
 0x284   : > { %1274 = vmatpush.msrb.mxu0 %v2771_v42  ;;  %1294 = vmatpush.msrb.mxu1 %v2783_v43 }
 0x285   : > { %1311 = vmatpush.msra.mxu2 %v2842_v52  ;;  %1331 = vmatpush.msra.mxu3 %v2925_v2 }
 0x286   : > { %1275 = vmatpush.msrb.mxu0 %v2804_v45  ;;  %1295 = vmatpush.msrb.mxu1 %v2809_v46 }
 0x287   : > { %1312 = vmatpush.msra.mxu2 %v2849_v53  ;;  %1332 = vmatpush.msra.mxu3 %v2949_v6 }
 0x288   : > { %1276 = vmatpush.msrb.mxu0 %v2814_v47  ;;  %1296 = vmatpush.msrb.mxu1 %v4051_v9 }
 0x289   : > { %1313 = vmatpush.msra.mxu2 %v2880_v58  ;;  %1333 = vmatpush.msra.mxu3 %v2977_v10 }
 0x28a   : > { %1277 = vmatpush.msrb.mxu0 %v2832_v50  ;;  %1297 = vmatpush.msrb.mxu1 %v4052_v24 }
 0x28b   : > { %1314 = vmatpush.msra.mxu2 %v2897_v61  ;;  %1334 = vmatpush.msra.mxu3 %v2999_v14 }
 0x28c   : > { %1278 = vmatpush.msrb.mxu0 %v2855_v54  ;;  %1298 = vmatpush.msrb.mxu1 %v2860_v55 }
 0x28d   : > { %1315 = vmatpush.msra.mxu2 %v2920_v1  ;;  %1335 = vmatpush.msra.mxu3 %v3021_v18 }
 0x28e   : > { %1279 = vmatpush.msrb.mxu0 %v2870_v56  ;;  %1299 = vmatpush.msrb.mxu1 %v4053_v15 }
 0x28f   : > { %1316 = vmatpush.msra.mxu2 %v2944_v5  ;;  %1336 = vmatpush.msra.mxu3 %v4054_v48 }
 0x290   : > { %1280 = vmatpush.msrb.mxu0 %v4055_v57  ;;  %1300 = vmatpush.msrb.mxu1 %v4056_v3 }
 0x291   : > { %1317 = vmatpush.msra.mxu2 %v4057_v19  ;;  %1337 = vmatpush.msra.mxu3 %v4058_v29 }
 0x292   : > { %1281 = vmatpush.msrb.mxu0 %v4059_v32  ;;  %1301 = vmatpush.msrb.mxu1 %v4060_v63 }
 0x293   : > { %1318 = vmatpush.msra.mxu2 %v4061_v51  ;;  %1338 = vmatpush.msra.mxu3 %v4062_v11 }
 0x294   : > { %1282 = vmatpush.msrb.mxu0 %v4063_v20  ;;  %1302 = vmatpush.msrb.mxu1 %v4064_v27 }
 0x295   : > { %1319 = vmatpush.msra.mxu2 %v4065_v17  ;;  %1339 = vmatpush.msra.mxu3 %v4066_v26 }
 0x296   : > { %1283 = vmatpush.msrb.mxu0 %v4067_v7  ;;  %1303 = vmatpush.msrb.mxu1 %v4068_v25 }
 0x297   : > { %1320 = vmatpush.msra.mxu2 %v4069_v13  ;;  %1340 = vmatpush.msra.mxu3 %v4070_v28 }
 0x298   : > { %1284 = vmatpush.msrb.mxu0 %v4071_v4  ;;  %1304 = vmatpush.msrb.mxu1 %v4072_v16 }
 0x299   : > { %1321 = vmatpush.msra.mxu2 %v4073_v30  ;;  %1341 = vmatpush.msra.mxu3 %v4074_v12 }
 0x29a   : > { %1285 = vmatpush.msrb.mxu0 %v4075_v21  ;;  %1305 = vmatpush.msrb.mxu1 %v4076_v44 }
 0x29b   : > { %1322 = vmatpush.msra.mxu2 %v4077_v22  ;;  %1342 = vmatpush.msra.mxu3 %v4078_v8 }
 0x29c   : > { %1355 = vmatpush.msra.mxu0 %v2721_v33  ;;  %1375 = vmatpush.msra.mxu1 %v2726_v34  ;;  %v4082_v33 = vld [vmem:[#allocation43_spill] sm:$0xff] }
 0x29d   : > { %1323 = vmatpush.msra.mxu2 %v4079_v23  ;;  %1343 = vmatpush.msra.mxu3 %v4080_v0  ;;  %v4083_v34 = vld [vmem:[#allocation39_spill] sm:$0xff] }
 0x29e   : > { %1356 = vmatpush.msra.mxu0 %v2733_v35  ;;  %1376 = vmatpush.msra.mxu1 %v2738_v36  ;;  %v4084_v35 = vld [vmem:[#allocation45_spill] sm:$0xff]  ;;  %v1185_v36 = vpop.permute.xlu1 %1184 }
 0x29f   : > { %1324 = vmatpush.msra.mxu2 %v4081_v40  ;;  %1344 = vmatpush.msra.mxu3 %v4082_v33 }
 0x2a0   : > { %1357 = vmatpush.msra.mxu0 %v2743_v37  ;;  %1377 = vmatpush.msra.mxu1 %v2750_v38 }
 0x2a1   : > { %1325 = vmatpush.msra.mxu2 %v4083_v34  ;;  %1345 = vmatpush.msra.mxu3 %v4084_v35 }
 0x2a2   : > { %1358 = vmatpush.msra.mxu0 %v2755_v39  ;;  %1378 = vmatpush.msra.mxu1 %v2766_v41 }
 0x2a3   : > { %1395 = vmatpush.msrb.mxu2 %v2826_v49  ;;  %1415 = vmatpush.msrb.mxu3 %v2903_v62 }
 0x2a4   : > { %1359 = vmatpush.msra.mxu0 %v2771_v42  ;;  %1379 = vmatpush.msra.mxu1 %v2783_v43 }
 0x2a5   : > { %1396 = vmatpush.msrb.mxu2 %v2842_v52  ;;  %1416 = vmatpush.msrb.mxu3 %v2925_v2  ;;  %v1453_v2 = vld.sshfl [vmem:[#allocation1] sm:$0xff pattern:$0x73625140] }
 0x2a6   : > { %1360 = vmatpush.msra.mxu0 %v2804_v45  ;;  %1380 = vmatpush.msra.mxu1 %v2809_v46 }
 0x2a7   : > { %1397 = vmatpush.msrb.mxu2 %v2849_v53  ;;  %1417 = vmatpush.msrb.mxu3 %v2949_v6 }
 0x2a8   : > { %1361 = vmatpush.msra.mxu0 %v2814_v47  ;;  %1381 = vmatpush.msra.mxu1 %v4051_v9 }
 0x2a9   : > { %1398 = vmatpush.msrb.mxu2 %v2880_v58  ;;  %1418 = vmatpush.msrb.mxu3 %v2977_v10  ;;  %v1455_v10 = vld.sshfl [vmem:[#allocation1 + $0x10] sm:$0xff pattern:$0x73625140] }
 0x2aa   : > { %1362 = vmatpush.msra.mxu0 %v2832_v50  ;;  %1382 = vmatpush.msra.mxu1 %v4052_v24 }
 0x2ab   : > { %1399 = vmatpush.msrb.mxu2 %v2897_v61  ;;  %1419 = vmatpush.msrb.mxu3 %v2999_v14  ;;  %v1456_v14 = vld.sshfl [vmem:[#allocation1 + $0x18] sm:$0xff pattern:$0x73625140] }
 0x2ac   : > { %1363 = vmatpush.msra.mxu0 %v2855_v54  ;;  %1383 = vmatpush.msra.mxu1 %v2860_v55 }
 0x2ad   : > { %1400 = vmatpush.msrb.mxu2 %v2920_v1  ;;  %1420 = vmatpush.msrb.mxu3 %v3021_v18 }
 0x2ae   : > { %1364 = vmatpush.msra.mxu0 %v2870_v56  ;;  %1384 = vmatpush.msra.mxu1 %v4053_v15 }
 0x2af   : > { %1401 = vmatpush.msrb.mxu2 %v2944_v5  ;;  %1421 = vmatpush.msrb.mxu3 %v4054_v48  ;;  %v1454_v5 = vld.sshfl [vmem:[#allocation1 + $0x8] sm:$0xff pattern:$0x73625140]  ;;  %v1990_v48 = vld [vmem:[%s3896_s10] sm:$0xff] }
 0x2b0   : > { %1365 = vmatpush.msra.mxu0 %v4055_v57  ;;  %1385 = vmatpush.msra.mxu1 %v4056_v3  ;;  %1552 = vst [vmem:[#allocation1] ss:$4 sm:$0xff] %v4085_v31 }
 0x2b1   : > { %1402 = vmatpush.msrb.mxu2 %v4057_v19  ;;  %1422 = vmatpush.msrb.mxu3 %v4058_v29 }
 0x2b2   : > { %1366 = vmatpush.msra.mxu0 %v4059_v32  ;;  %1386 = vmatpush.msra.mxu1 %v4060_v63 }
 0x2b3   : > { %1403 = vmatpush.msrb.mxu2 %v4061_v51  ;;  %1423 = vmatpush.msrb.mxu3 %v4062_v11 }
 0x2b4   : > { %1367 = vmatpush.msra.mxu0 %v4063_v20  ;;  %1387 = vmatpush.msra.mxu1 %v4064_v27 }
 0x2b5   : > { %1404 = vmatpush.msrb.mxu2 %v4065_v17  ;;  %1424 = vmatpush.msrb.mxu3 %v4066_v26 }
 0x2b6   : > { %1368 = vmatpush.msra.mxu0 %v4067_v7  ;;  %1388 = vmatpush.msra.mxu1 %v4068_v25 }
 0x2b7   : > { %1405 = vmatpush.msrb.mxu2 %v4069_v13  ;;  %1425 = vmatpush.msrb.mxu3 %v4070_v28  ;;  %v1553_v19 = vld.sshfl [vmem:[#allocation1] sm:$0xff pattern:$0x73625140]  ;;  %v1554_v29 = vld.sshfl [vmem:[#allocation1 + $0x8] sm:$0xff pattern:$0x73625140] }
 0x2b8   : > { %1369 = vmatpush.msra.mxu0 %v4071_v4  ;;  %1389 = vmatpush.msra.mxu1 %v4072_v16  ;;  %1998 = vst [vmem:[#allocation1] ss:$2 sm:$0xff] %v1990_v48  ;;  %v1555_v63 = vld.sshfl [vmem:[#allocation1 + $0x10] sm:$0xff pattern:$0x73625140]  ;;  %v588_v13 = vld [vmem:[%s3295_s23 + $0x20] sm:$0xff] }
 0x2b9   : > { %1406 = vmatpush.msrb.mxu2 %v4073_v30  ;;  %1426 = vmatpush.msrb.mxu3 %v4074_v12  ;;  %v1556_v51 = vld.sshfl [vmem:[#allocation1 + $0x18] sm:$0xff pattern:$0x73625140]  ;;  %v589_v30 = vld [vmem:[%s3295_s23 + $0x28] sm:$0xff]  ;;  %v4092_v48 = vld [vmem:[#allocation46_spill] sm:$0xff] }
 0x2ba   : > { %1370 = vmatpush.msra.mxu0 %v4075_v21  ;;  %1390 = vmatpush.msra.mxu1 %v4076_v44 }
 0x2bb   : > { %1407 = vmatpush.msrb.mxu2 %v4077_v22  ;;  %1427 = vmatpush.msrb.mxu3 %v4078_v8 }
 0x2bd   : > { %1408 = vmatpush.msrb.mxu2 %v4079_v23  ;;  %1428 = vmatpush.msrb.mxu3 %v4080_v0 }
 0x2bf   : > { %1409 = vmatpush.msrb.mxu2 %v4081_v40  ;;  %1429 = vmatpush.msrb.mxu3 %v4082_v33 }
 0x2c1   : > { %1410 = vmatpush.msrb.mxu2 %v4083_v34  ;;  %1430 = vmatpush.msrb.mxu3 %v4084_v35 }
 0x2f7   : > { %v1207_v37 = vpop.f32.mrf.mxu0  ;;  %v1227_v38 = vpop.f32.mrf.mxu1 }
 0x2f8   : > { %v3461_v39 = vadd.f32 %v1207_v37, %v1185_v36  ;;  %v3463_v41 = vadd.f32 %v1227_v38, %v1185_v36 }
 0x2fa   : > { %1286 = vmatmul.f32.vlgmr.msrb.gmra.mxu0 %v3461_v39  ;;  %1306 = vmatmul.f32.vlgmr.msrb.gmra.mxu1 %v3463_v41  ;;  %v1351_v42 = vmul.f32 %v3461_v39, %v3461_v39  ;;  %v1352_v43 = vmul.f32 %v3463_v41, %v3463_v41 }
 0x2fb   : > { %2287 = vmatpush.msk.msrb.mxu0 %vm944_vm4, %v1453_v2  ;;  %2289 = vmatpush.msk.msrb.mxu1 %vm944_vm4, %v1454_v5  ;;  %v4091_v2 = vld [vmem:[#allocation3_spill] sm:$0xff] }
 0x302   : > { %1371 = vmatmul.f32.vlgmr.msra.gmra.mxu0 %v1351_v42  ;;  %1391 = vmatmul.f32.vlgmr.msra.gmra.mxu1 %v1352_v43  ;;  %v4086_v42 = vmov 0.0  }
 0x303   : > { %2295 = vmatpush.msk.msra.mxu0 %vm944_vm4, %v1553_v19  ;;  %2297 = vmatpush.msk.msra.mxu1 %vm944_vm4, %v1554_v29 }
 0x304   : > { %v1247_v45 = vpop.f32.mrf.mxu2  ;;  %v1267_v46 = vpop.f32.mrf.mxu3 }
 0x305   : > { %v3471_v47 = vadd.f32 %v1247_v45, %v1185_v36  ;;  %v3473_v49 = vadd.f32 %v1267_v46, %v1185_v36 }
 0x307   : > { %1326 = vmatmul.f32.vlgmr.msra.gmra.mxu2 %v3471_v47  ;;  %1346 = vmatmul.f32.vlgmr.msra.gmra.mxu3 %v3473_v49  ;;  %v1353_v50 = vmul.f32 %v3471_v47, %v3471_v47  ;;  %v1354_v52 = vmul.f32 %v3473_v49, %v3473_v49 }
 0x308   : > { %2291 = vmatpush.msk.msra.mxu2 %vm944_vm4, %v1455_v10  ;;  %2293 = vmatpush.msk.msra.mxu3 %vm944_vm4, %v1456_v14  ;;  %v3553_v14 = vpop.permute.xlu2 %2402 }
 0x30f   : > { %1411 = vmatmul.f32.vlgmr.msrb.gmra.mxu2 %v1353_v50  ;;  %1431 = vmatmul.f32.vlgmr.msrb.gmra.mxu3 %v1354_v52 }
 0x310   : > { %2299 = vmatpush.msk.msrb.mxu2 %vm944_vm4, %v1555_v63  ;;  %2301 = vmatpush.msk.msrb.mxu3 %vm944_vm4, %v1556_v51  ;;  %v3557_v31 = vpop.permute.xlu2 %2417  ;;  %v3577_v63 = vpop.permute.xlu0 %2412  ;;  %vm1825_vm4 = vcmask 908288  }
 0x377   : > { %v1287_v53 = vpop.f32.mrf.mxu0  ;;  %v1307_v54 = vpop.f32.mrf.mxu1 }
 0x378   : > { %v1308_v55 = vadd.f32 %v1307_v54, %v1287_v53 }
 0x37f   : > { %v1372_v62 = vpop.f32.mrf.mxu0  ;;  %v1392_v1 = vpop.f32.mrf.mxu1 }
 0x380   : > { %v1393_v18 = vadd.f32 %v1392_v1, %v1372_v62  ;;  %v4090_v1 = vld [vmem:[#allocation9_spill] sm:$0xff] }
 0x38a   : > { %v1327_v56 = vpop.f32.mrf.mxu2  ;;  %v1347_v58 = vpop.f32.mrf.mxu3 }
 0x38b   : > { %v1328_v61 = vadd.f32 %v1327_v56, %v1308_v55 }
 0x38d   : > { %v1348_v6 = vadd.f32 %v1347_v58, %v1328_v61  ;;  %v4088_v58 = vld [vmem:[#allocation8_spill] sm:$0xff]  ;;  %v4089_v61 = vld [vmem:[#allocation7_spill] sm:$0xff] }
 0x38f   : > { %v1350_v60 = vmul.f32 0.00390625, %v1348_v6  ;;  %v3548_v6 = vpop.permute.xlu1 %2337 }
 0x391   : > { %v1436_v57 = vmul.f32 %v1350_v60, %v1350_v60 }
 0x392   : > { %v1412_v59 = vpop.f32.mrf.mxu2  ;;  %v1432_v24 = vpop.f32.mrf.mxu3 }
 0x393   : > { %v1413_v9 = vadd.f32 %v1412_v59, %v1393_v18 }
 0x395   : > { %v1433_v15 = vadd.f32 %v1432_v24, %v1413_v9  ;;  %v2340_v9 = vunpack.i.h.bf16 %v3548_v6 }
 0x397   : > { %v1435_v3 = vmul.f32 0.00390625, %v1433_v15  ;;  %v3551_v10 = vpop.permute.xlu1 %2352 }
 0x399   : > { %v1437_v32 = vsub.f32 %v1435_v3, %v1436_v57  ;;  %v2369_v57 = vunpack.i.l.bf16 %v4092_v48 }
 0x39b   : > { %v1438_v11 = vadd.f32 1e-05, %v1437_v32  ;;  %v1937_v19 = vsel %vm1936_vm3, %v2340_v9, %v2369_v57  ;;  %v4098_v9 = vld [vmem:[#allocation49_spill] sm:$0xff] }
 0x39d   : > { %2536 = vrsqrt.f32 %v1438_v11  ;;  %vm1445_vm13 = vweird.f32 %v1438_v11 }
 0x39f   : > { %v3555_v18 = vpop.permute.xlu1 %2362 }
 0x3a3   : > { %v2537_v20 = vpop.eup %2536 }
 0x3a4   : > { %v1440_v27 = vmul.f32 %v2537_v20, %v1438_v11  ;;  %vm1446_vm12 = vweird.f32 %v2537_v20 }
 0x3a5   : > { %vm1447_vm14 = vmor %vm1445_vm13, %vm1446_vm12 }
 0x3a6   : > { %v1441_v17 = vmul.f32 %v2537_v20, %v1440_v27 }
 0x3a7   : > { %v3559_v59 = vpop.permute.xlu1 %2372 }
 0x3a8   : > { %v1442_v26 = vmul.f32 0.5, %v1441_v17  ;;  %v2374_v11 = vunpack.i.l.bf16 %v3559_v59 }
 0x3aa   : > { %v1443_v7 = vsub.f32 1.5, %v1442_v26 }
 0x3ac   : > { %v1444_v25 = vmul.f32 %v2537_v20, %v1443_v7  ;;  %v4093_v7 = vld [vmem:[#allocation50_spill] sm:$0xff] }
 0x3ae   : > { %v1448_v28 = vsel %vm1447_vm14, %v2537_v20, %v1444_v25  ;;  %v3996_v25 = vunpack.i.h.bf16 %v4093_v7 }
 0x3af   : > { %v1449_v4 = vmul.f32 %v1448_v28, %v588_v13  ;;  %v3573_v29 = vpop.permute.xlu1 %2387  ;;  %v4094_v28 = vld [vmem:[#allocation47_spill] sm:$0xff] }
 0x3b1   : > { %2288 = vmatmul.msk.f32.vlgmr.msrb.gmra.mxu0 %vm937_vm8, %v1449_v4  ;;  %2290 = vmatmul.msk.f32.vlgmr.msrb.gmra.mxu1 %vm937_vm8, %v1449_v4  ;;  %v1450_v16 = vmul.f32 %v1449_v4, %v1350_v60 }
 0x3b2   : > { %2292 = vmatmul.msk.f32.vlgmr.msra.gmra.mxu2 %vm937_vm8, %v1449_v4  ;;  %2294 = vmatmul.msk.f32.vlgmr.msra.gmra.mxu3 %vm937_vm8, %v1449_v4  ;;  %v2345_v4 = vunpack.i.h.bf16 %v4094_v28 }
 0x3b3   : > { %v1451_v12 = vsub.f32 %v589_v30, %v1450_v16 }
 0x3b7   : > { %v3575_v32 = vpop.permute.xlu1 %2407 }
 0x3b9   : > { %2296 = vmatmul.msk.f32.vlgmr.msra.gmra.mxu0 %vm937_vm8, %v1451_v12  ;;  %2298 = vmatmul.msk.f32.vlgmr.msra.gmra.mxu1 %vm937_vm8, %v1451_v12 }
 0x3ba   : > { %2300 = vmatmul.msk.f32.vlgmr.msrb.gmra.mxu2 %vm937_vm8, %v1451_v12  ;;  %2302 = vmatmul.msk.f32.vlgmr.msrb.gmra.mxu3 %vm937_vm8, %v1451_v12  ;;  %v1900_v12 = vsel %vm1899_vm15, %v2345_v4, %v2374_v11 }
 0x42e   : > { %v1485_v21 = vpop.f32.mrf.mxu0  ;;  %v1505_v44 = vpop.f32.mrf.mxu1 }
 0x42f   : > { %v1548_v22 = vmul.f32 %v1485_v21, %v3461_v39  ;;  %v1549_v8 = vmul.f32 %v1505_v44, %v3463_v41 }
 0x435   : > { %v1525_v23 = vpop.f32.mrf.mxu2  ;;  %v1545_v0 = vpop.f32.mrf.mxu3 }
 0x436   : > { %v1585_v40 = vpop.f32.mrf.mxu0  ;;  %v1605_v33 = vpop.f32.mrf.mxu1  ;;  %v1550_v45 = vmul.f32 %v1525_v23, %v3471_v47  ;;  %v1551_v46 = vmul.f32 %v1545_v0, %v3473_v49  ;;  %v4087_v49 = vld [vmem:[#allocation5_spill] sm:$0xff] }
 0x437   : > { %v1648_v34 = vadd.f32 %v1585_v40, %v1548_v22  ;;  %v1649_v35 = vadd.f32 %v1605_v33, %v1549_v8  ;;  %v4095_v22 = vld [vmem:[#allocation52_spill] sm:$0xff] }
 0x438   : > { %v2379_v8 = vunpack.i.l.bf16 %v4095_v22  ;;  %v4096_v33 = vld [vmem:[#allocation44_spill] sm:$0xff] }
 0x439   : > { %v3505_v36 = vmax.f32 %v1648_v34, 0.0  ;;  %v3507_v37 = vmax.f32 %v1649_v35, 0.0  ;;  %v2350_v34 = vunpack.i.h.bf16 %v4096_v33 }
 0x43b   : > { %v2431_v38 = vpack.i.bf16 %v3507_v37, %v3505_v36  ;;  %v2421_v43 = vpack.i.bf16 %v3505_v36, %v4086_v42  ;;  %v2521_v5 = vpack.i.bf16 %v4091_v2, %v3505_v36 }
 0x43d   : > { %2432 = vrot.lane.b32.xlu1 %v2431_v38, %s2556_s24  ;;  %2427 = vrot.lane.b32.xlu2 %v2431_v38, %s2557_s25  ;;  %v1625_v39 = vpop.f32.mrf.mxu2  ;;  %v1645_v41 = vpop.f32.mrf.mxu3 }
 0x43e   : > { %2422 = vrot.lane.b32.xlu0 %v2421_v43, %s2558_s26  ;;  %v1650_v50 = vadd.f32 %v1625_v39, %v1550_v45  ;;  %v1651_v52 = vadd.f32 %v1645_v41, %v1551_v46  ;;  %v2355_v43 = vunpack.i.h.bf16 %v3551_v10  ;;  %v1863_v39 = vsel %vm1862_vm1, %v2350_v34, %v2379_v8  ;;  %v4097_v41 = vld [vmem:[#allocation48_spill] sm:$0xff] }
 0x43f   : > { %v2384_v45 = vunpack.i.l.bf16 %v4097_v41 }
 0x440   : > { %v3521_v53 = vmax.f32 %v1650_v50, 0.0  ;;  %v3523_v54 = vmax.f32 %v1651_v52, 0.0 }
 0x442   : > { %v2451_v55 = vpack.i.bf16 %v3521_v53, %v3507_v37  ;;  %v2456_v56 = vpack.i.bf16 0.0, %v3523_v54  ;;  %v2486_v47 = vpack.i.bf16 %v3523_v54, %v3521_v53  ;;  %v2516_v62 = vpack.i.bf16 %v4089_v61, %v3523_v54 }
 0x445   : > { %2447 = vrot.lane.b32.xlu1 %v2431_v38, %s2559_s30  ;;  %2442 = vrot.lane.b32.xlu2 %v2431_v38, %s2560_s13 }
 0x446   : > { %2437 = vrot.lane.b32.xlu0 %v2431_v38, %s2561_s14 }
 0x44d   : > { %2452 = vrot.lane.b32.xlu1 %v2451_v55, %s2558_s26  ;;  %2457 = vrot.lane.b32.xlu2 %v2456_v56, %s2558_s26  ;;  %v2365_v56 = vunpack.i.h.bf16 %v3555_v18  ;;  %s2310_s26 = sshll.u32 %s2647_s27, 4 }
 0x44e   : > { %2462 = vrot.lane.b32.xlu0 %v2451_v55, %s2562_s15 }
 0x455   : > { %2487 = vrot.lane.b32.xlu1 %v2486_v47, %s2561_s14  ;;  %2477 = vrot.lane.b32.xlu2 %v2486_v47, %s2556_s24  ;;  %s413_s14 = scalar_lea.vmem %s3898_s12, %s2310_s26 }
 0x456   : > { %2467 = vrot.lane.b32.xlu0 %v2486_v47, %s2557_s25 }
 0x45d   : > { %2502 = vrot.lane.b32.xlu1 %v2486_v47, %s2563_s17  ;;  %2482 = vrot.lane.b32.xlu2 %v4087_v49, %s2563_s17  ;;  %v1826_v49 = vsel %vm1825_vm4, %v2355_v43, %v2384_v45  ;;  %v2375_v43 = vunpack.i.h.bf16 %v3559_v59 }
 0x45e   : > { %2472 = vrot.lane.b32.xlu0 %v2431_v38, %s2563_s17 }
 0x465   : > { %2507 = vrot.lane.b32.xlu1 %v4088_v58, %s2563_s17  ;;  %2497 = vrot.lane.b32.xlu2 %v2486_v47, %s2559_s30  ;;  %v2364_v58 = vunpack.i.l.bf16 %v3555_v18  ;;  %v1991_v18 = vld [vmem:[%s3897_s11] sm:$0xf] }
 0x466   : > { %2492 = vrot.lane.b32.xlu0 %v2486_v47, %s2560_s13 }
 0x467   : > { %v1975_v4 = vsel %vm1973_vm6, %v2364_v58, %v2365_v56 }
 0x46d   : > { %2527 = vrot.lane.b32.xlu1 %v4086_v42, %s2562_s15  ;;  %2512 = vrot.lane.b32.xlu2 %v4090_v1, %s2563_s17 }
 0x46e   : > { %2517 = vrot.lane.b32.xlu0 %v2516_v62, %s2562_s15  ;;  %v2389_v62 = vunpack.i.l.bf16 %v3573_v29 }
 0x475   : > { %1994 = vperm.xlu2 %2531, %v1991_v18  }
 0x476   : > { %2522 = vrot.lane.b32.xlu0 %v2521_v5, %s2562_s15 }
 0x497   : > { %v3561_v60 = vpop.permute.xlu2 %2427 }
 0x498   : > { %v2430_v24 = vunpack.i.h.bf16 %v3561_v60  ;;  %v2429_v15 = vunpack.i.l.bf16 %v3561_v60 }
 0x49a   : > { %v1941_v3 = vsel %vm1936_vm3, %v2429_v15, %v2430_v24  ;;  %v2360_v15 = vunpack.i.h.bf16 %v4098_v9 }
 0x49b   : > { %2004 = vmatpush.msrb.mxu0 %v1941_v3 }
 0x49d   : > { %2005 = vmatpush.msrb.mxu0 %v1937_v19 }
 0x49f   : > { %v3582_v20 = vpop.permute.xlu2 %2442 }
 0x4a0   : > { %v2445_v35 = vunpack.i.h.bf16 %v3582_v20  ;;  %v2444_v38 = vunpack.i.l.bf16 %v3582_v20 }
 0x4a2   : > { %v1830_v55 = vsel %vm1825_vm4, %v2444_v38, %v2445_v35 }
 0x4a7   : > { %v3609_v40 = vpop.permute.xlu2 %2457 }
 0x4af   : > { %v3579_v51 = vpop.permute.xlu1 %2432 }
 0x4b0   : > { %v2435_v27 = vunpack.i.h.bf16 %v3579_v51  ;;  %v2434_v17 = vunpack.i.l.bf16 %v3579_v51  ;;  %v3586_v26 = vpop.permute.xlu0 %2422 }
 0x4b1   : > { %v2424_v13 = vunpack.i.l.bf16 %v3586_v26 }
 0x4b2   : > { %v1904_v16 = vsel %vm1899_vm15, %v2434_v17, %v2435_v27  ;;  %v3648_v17 = vpop.permute.xlu2 %2477 }
 0x4b3   : > { %2006 = vmatpush.msrb.mxu0 %v1904_v16  ;;  %v3597_v30 = vsel %vm1714_vm2, %v3996_v25, %v2424_v13  ;;  %v1789_v13 = vsel %vm1788_vm5, %v2360_v15, %v2389_v62  ;;  %v3658_v16 = vld.sshfl [vmem:[#allocation1 + $0x8] sm:$0xff pattern:$0x75316420]  ;;  %v2479_v38 = vunpack.i.l.bf16 %v3648_v17  ;;  %v2390_v25 = vunpack.i.h.bf16 %v3573_v29 }
 0x4b5   : > { %2007 = vmatpush.msrb.mxu0 %v1900_v12  ;;  %v1905_v60 = vsel %vm1899_vm15, %v2435_v27, %v2479_v38 }
 0x4b7   : > { %v3602_v21 = vpop.permute.xlu1 %2447 }
 0x4b8   : > { %v3604_v44 = vpop.permute.xlu0 %2437  ;;  %v2450_v46 = vunpack.i.h.bf16 %v3602_v21  ;;  %v2449_v50 = vunpack.i.l.bf16 %v3602_v21 }
 0x4b9   : > { %v2440_v23 = vunpack.i.h.bf16 %v3604_v44  ;;  %v2439_v0 = vunpack.i.l.bf16 %v3604_v44 }
 0x4ba   : > { %v1793_v3 = vsel %vm1788_vm5, %v2449_v50, %v2450_v46 }
 0x4bb   : > { %v1867_v42 = vsel %vm1862_vm1, %v2439_v0, %v2440_v23 }
 0x4bc   : > { %2008 = vmatpush.msrb.mxu0 %v1867_v42 }
 0x4be   : > { %2009 = vmatpush.msrb.mxu0 %v1863_v39  ;;  %v4099_v39 = vunpack.i.h.bf16 %v4092_v48 }
 0x4bf   : > { %v3624_v52 = vpop.permute.xlu1 %2452 }
 0x4c0   : > { %v3630_v47 = vpop.permute.xlu0 %2462  ;;  %2010 = vmatpush.msrb.mxu0 %v1830_v55  ;;  %v1938_v50 = vsel %vm1936_vm3, %v2369_v57, %v4099_v39  ;;  %v3679_v55 = vpop.permute.xlu2 %2482  ;;  %v1901_v57 = vsel %vm1899_vm15, %v2374_v11, %v2375_v43 }
 0x4c1   : > { %v2465_v1 = vunpack.i.h.bf16 %v3630_v47  ;;  %v2464_v5 = vunpack.i.l.bf16 %v3630_v47  ;;  %v4105_v47 = vld [vmem:[#allocation4_spill] sm:$0xff] }
 0x4c2   : > { %2011 = vmatpush.msrb.mxu0 %v1826_v49 }
 0x4c3   : > { %v1979_v19 = vsel %vm1973_vm6, %v2464_v5, %v2465_v1 }
 0x4c4   : > { %2012 = vmatpush.msrb.mxu0 %v1793_v3  ;;  %2078 = vmatpush.msra.mxu3 %v1979_v19  ;;  %v2380_v3 = vunpack.i.h.bf16 %v4095_v22 }
 0x4c6   : > { %2013 = vmatpush.msrb.mxu0 %v1789_v13  ;;  %2079 = vmatpush.msra.mxu3 %v1975_v4  ;;  %v1864_v27 = vsel %vm1862_vm1, %v2379_v8, %v2380_v3  ;;  %v2485_v4 = vunpack.i.h.bf16 %v3679_v55  ;;  %v2425_v8 = vunpack.i.h.bf16 %v3586_v26 }
 0x4c7   : > { %v3660_v12 = vpop.permute.xlu1 %2487  ;;  %2304 = vmatmul.msk.f32.vlgmr.msra.gmra.mxu3 %vm494_vm0, %v3658_v16 }
 0x4c8   : > { %v3664_v0 = vpop.permute.xlu0 %2467  ;;  %v2489_v49 = vunpack.i.l.bf16 %v3660_v12  ;;  %v3710_v39 = vpop.permute.xlu2 %2497 }
 0x4c9   : > { %v2469_v34 = vunpack.i.l.bf16 %v3664_v0 }
 0x4ca   : > { %v1868_v51 = vsel %vm1862_vm1, %v2440_v23, %v2489_v49 }
 0x4cb   : > { %v1942_v42 = vsel %vm1936_vm3, %v2430_v24, %v2469_v34 }
 0x4cc   : > { %2044 = vmatpush.msra.mxu2 %v1942_v42  ;;  %v2454_v42 = vunpack.i.l.bf16 %v3624_v52 }
 0x4ce   : > { %2045 = vmatpush.msra.mxu2 %v1938_v50  ;;  %v3997_v50 = vunpack.i.h.bf16 %v4097_v41 }
 0x4cf   : > { %v3682_v15 = vpop.permute.xlu1 %2502 }
 0x4d0   : > { %v2473_v24 = vpop.permute.xlu0 %2472  ;;  %2046 = vmatpush.msra.mxu2 %v1905_v60  ;;  %v1827_v26 = vsel %vm1825_vm4, %v2384_v45, %v3997_v50  ;;  %v2504_v20 = vunpack.i.l.bf16 %v3682_v15 }
 0x4d1   : > { %v2475_v48 = vunpack.i.h.bf16 %v2473_v24  ;;  %v2474_v19 = vunpack.i.l.bf16 %v2473_v24  ;;  %v4100_v24 = vld [vmem:[#allocation38_spill] sm:$0xff] }
 0x4d2   : > { %2047 = vmatpush.msra.mxu2 %v1901_v57 }
 0x4d3   : > { %v1756_v13 = vsel %vm1751_vm7, %v2474_v19, %v2475_v48  ;;  %v2334_v19 = vunpack.i.l.bf16 %v4100_v24 }
 0x4d4   : > { %2014 = vmatpush.msrb.mxu0 %v1756_v13  ;;  %2048 = vmatpush.msra.mxu2 %v1868_v51  ;;  %v2499_v13 = vunpack.i.l.bf16 %v3710_v39 }
 0x4d6   : > { %2049 = vmatpush.msra.mxu2 %v1864_v27  ;;  %v1719_v27 = vsel %vm1714_vm2, %v2425_v8, %v2454_v42  ;;  %v1794_v8 = vsel %vm1788_vm5, %v2450_v46, %v2499_v13  ;;  %v2455_v46 = vunpack.i.h.bf16 %v3624_v52 }
 0x4d7   : > { %v3706_v11 = vpop.permute.xlu1 %2507 }
 0x4d8   : > { %v2509_v44 = vunpack.i.l.bf16 %v3706_v11  ;;  %v3713_v23 = vpop.permute.xlu0 %2492  ;;  %v2510_v45 = vunpack.i.h.bf16 %v3706_v11 }
 0x4d9   : > { %v2494_v60 = vunpack.i.l.bf16 %v3713_v23 }
 0x4da   : > { %v1752_v57 = vsel %vm1751_vm7, %v2485_v4, %v2509_v44  ;;  %v4101_v4 = vunpack.i.h.bf16 %v4100_v24  ;;  %v1790_v24 = vsel %vm1788_vm5, %v2389_v62, %v2390_v25  ;;  %v2339_v62 = vunpack.i.l.bf16 %v3548_v6 }
 0x4db   : > { %2015 = vmatpush.msrb.mxu0 %v1752_v57  ;;  %v1831_v51 = vsel %vm1825_vm4, %v2445_v35, %v2494_v60 }
 0x4dc   : > { %2050 = vmatpush.msra.mxu2 %v1831_v51  ;;  %v1715_v57 = vsel %vm1714_vm2, %v2334_v19, %v4101_v4  ;;  %v2470_v19 = vunpack.i.h.bf16 %v3664_v0  ;;  %v1757_v4 = vsel %vm1751_vm7, %v2475_v48, %v2504_v20  ;;  %v2414_v0 = vunpack.i.l.bf16 %v3577_v63 }
 0x4dd   : > { %2016 = vmatpush.msrb.mxu0 %v1719_v27 }
 0x4de   : > { %2051 = vmatpush.msra.mxu2 %v1827_v26 }
 0x4df   : > { %v2528_v35 = vpop.permute.xlu1 %2527  ;;  %2017 = vmatpush.msrb.mxu0 %v1715_v57 }
 0x4e0   : > { %v2529_v51 = vunpack.i.l.bf16 %v2528_v35  ;;  %v2518_v27 = vpop.permute.xlu0 %2517  ;;  %2052 = vmatpush.msra.mxu2 %v1794_v8  ;;  %v2530_v21 = vunpack.i.h.bf16 %v2528_v35  ;;  %v4102_v8 = vld [vmem:[#allocation53_spill] sm:$0xff]  ;;  %v2480_v35 = vunpack.i.h.bf16 %v3648_v17 }
 0x4e1   : > { %v2520_v26 = vunpack.i.h.bf16 %v2518_v27  ;;  %v2519_v50 = vunpack.i.l.bf16 %v2518_v27  ;;  %2018 = vmatpush.msrb.mxu0 %v3505_v36  ;;  %v2400_v27 = vunpack.i.h.bf16 %v4102_v8 }
 0x4e2   : > { %2053 = vmatpush.msra.mxu2 %v1790_v24  ;;  %v2404_v24 = vunpack.i.l.bf16 %v3553_v14 }
 0x4e3   : > { %2019 = vmatpush.msrb.mxu0 %v4091_v2  ;;  %v1980_v36 = vsel %vm1973_vm6, %v2465_v1, %v2519_v50  ;;  %v1981_v57 = vsel %vm1973_vm6, %v2519_v50, %v2529_v51  ;;  %v1753_v2 = vsel %vm1751_vm7, %v2509_v44, %v2510_v45  ;;  %v1976_v48 = vsel %vm1973_vm6, %v2365_v56, %v2520_v26  ;;  %v3773_v51 = vld.sshfl [vmem:[#allocation1] sm:$0xff pattern:$0x75316420] }
 0x4e4   : > { %2054 = vmatpush.msra.mxu2 %v1757_v4  ;;  %2118 = vmatpush.msrb.mxu3 %v1980_v36  ;;  %v1944_v1 = vsel %vm1936_vm3, %v2470_v19, %v2339_v62  ;;  %v1977_v6 = vsel %vm1973_vm6, %v2520_v26, %v2530_v21  ;;  %v1720_v50 = vsel %vm1714_vm2, %v2454_v42, %v2455_v46  ;;  %v2344_v44 = vunpack.i.l.bf16 %v4094_v28  ;;  %v4104_v42 = vld [vmem:[#allocation51_spill] sm:$0xff] }
 0x4e5   : > { %2158 = vmatpush.msra.mxu0 %v1981_v57  ;;  %v2405_v56 = vunpack.i.h.bf16 %v3553_v14  ;;  %v4103_v36 = vunpack.i.l.bf16 %v4102_v8  ;;  %v2490_v14 = vunpack.i.h.bf16 %v3660_v12 }
 0x4e6   : > { %2055 = vmatpush.msra.mxu2 %v1753_v2  ;;  %2119 = vmatpush.msrb.mxu3 %v1976_v48  ;;  %v1907_v62 = vsel %vm1899_vm15, %v2480_v35, %v2344_v44  ;;  %v2410_v2 = vunpack.i.h.bf16 %v3575_v32  ;;  %v2409_v48 = vunpack.i.l.bf16 %v3575_v32  ;;  %v2354_v32 = vunpack.i.l.bf16 %v3551_v10 }
 0x4e7   : > { %2159 = vmatpush.msra.mxu0 %v1977_v6  ;;  %v1940_v26 = vsel %vm1936_vm3, %v4103_v36, %v2400_v27  ;;  %2305 = vmatmul.msk.f32.vlgmr.msrb.gmra.mxu3 %vm494_vm0, %v3658_v16  ;;  %v1903_v8 = vsel %vm1899_vm15, %v2404_v24, %v2405_v56  ;;  %v2349_v27 = vunpack.i.l.bf16 %v4096_v33  ;;  %v1906_v6 = vsel %vm1899_vm15, %v2479_v38, %v2480_v35  ;;  %v2513_v38 = vpop.permute.xlu2 %2512 }
 0x4e8   : > { %2124 = vmatpush.msra.mxu3 %v1944_v1  ;;  %v2523_v4 = vpop.permute.xlu0 %2522  ;;  %2056 = vmatpush.msra.mxu2 %v1720_v50  ;;  %v2500_v50 = vunpack.i.h.bf16 %v3710_v39  ;;  %v2359_v44 = vunpack.i.l.bf16 %v4098_v9  ;;  %v2419_v56 = vunpack.i.l.bf16 %v3557_v31  ;;  %v1869_v35 = vsel %vm1862_vm1, %v2489_v49, %v2490_v14 }
 0x4e9   : > { %2020 = vmatmul.f32.vlgmr.msrb.gmra.mxu0 %v3773_v51  ;;  %v2525_v21 = vunpack.i.h.bf16 %v2523_v4  ;;  %v2524_v57 = vunpack.i.l.bf16 %v2523_v4  ;;  %v1870_v33 = vsel %vm1862_vm1, %v2490_v14, %v2349_v27  ;;  %v2505_v4 = vunpack.i.h.bf16 %v3682_v15  ;;  %v4110_v15 = vld [vmem:[#allocation6_spill] sm:$0xff] }
 0x4ea   : > { %2125 = vmatpush.msra.mxu3 %v1940_v26  ;;  %2057 = vmatpush.msra.mxu2 %v4104_v42  ;;  %v1796_v59 = vsel %vm1788_vm5, %v2500_v50, %v2359_v44  ;;  %v1865_v9 = vsel %vm1862_vm1, %v2380_v3, %v2409_v48  ;;  %v2460_v49 = vunpack.i.h.bf16 %v3609_v40  ;;  %v2459_v26 = vunpack.i.l.bf16 %v3609_v40 }
 0x4eb   : > { %v1978_v28 = vsel %vm1973_vm6, %v2524_v57, %v2464_v5  ;;  %v1974_v1 = vsel %vm1973_vm6, %v2525_v21, %v2364_v58  ;;  %v2495_v5 = vunpack.i.h.bf16 %v3713_v23  ;;  %v2415_v58 = vunpack.i.h.bf16 %v3577_v63 }
 0x4ec   : > { %2126 = vmatpush.msra.mxu3 %v1907_v62  ;;  %2038 = vmatpush.msrb.mxu1 %v1978_v28  ;;  %v1902_v63 = vsel %vm1899_vm15, %v2375_v43, %v2404_v24  ;;  %v2515_v43 = vunpack.i.h.bf16 %v2513_v38  ;;  %v2514_v24 = vunpack.i.l.bf16 %v2513_v38  ;;  %v1795_v23 = vsel %vm1788_vm5, %v2499_v13, %v2500_v50 }
 0x4ed   : > { %2058 = vmatpush.msra.mxu2 %v3507_v37  ;;  %v1943_v37 = vsel %vm1936_vm3, %v2469_v34, %v2470_v19  ;;  %v4106_v34 = vld [vmem:[#allocation54_spill] sm:$0xff]  ;;  %v1866_v19 = vsel %vm1862_vm1, %v2409_v48, %v2410_v2  ;;  %v1833_v10 = vsel %vm1825_vm4, %v2495_v5, %v2354_v32  ;;  %v1829_v17 = vsel %vm1825_vm4, %v2414_v0, %v2415_v58 }
 0x4ee   : > { %2127 = vmatpush.msra.mxu3 %v1903_v8  ;;  %2039 = vmatpush.msrb.mxu1 %v1974_v1  ;;  %v1832_v12 = vsel %vm1825_vm4, %v2494_v60, %v2495_v5  ;;  %v1755_v21 = vsel %vm1751_vm7, %v2514_v24, %v2515_v43  ;;  %v1722_v60 = vsel %vm1714_vm2, %v2459_v26, %v2460_v49 }
 0x4ef   : > { %2059 = vmatpush.msra.mxu2 %v4105_v47  ;;  %2303 = vmatmul.msk.f32.vlgmr.msrb.gmra.mxu1 %vm494_vm0, %v3658_v16  ;;  %v1791_v40 = vsel %vm1788_vm5, %v2390_v25, %v2419_v56  ;;  %v1754_v39 = vsel %vm1751_vm7, %v2510_v45, %v2514_v24  ;;  %v1721_v29 = vsel %vm1714_vm2, %v2455_v46, %v2459_v26  ;;  %v4108_v25 = vunpack.i.h.bf16 %v4093_v7  ;;  %v1995_v52 = vpop.permute.xlu2 %1994 }
 0x4f0   : > { %2060 = vmatmul.f32.vlgmr.msra.gmra.mxu2 %v3773_v51  ;;  %2084 = vmatpush.msra.mxu1 %v1943_v37 }
 0x4f1   : > { %2128 = vmatpush.msra.mxu3 %v1870_v33  ;;  %2306 = vmatmul.msk.f32.vlgmr.msra.gmra.mxu0 %vm494_vm0, %v3658_v16  ;;  %v2420_v16 = vunpack.i.h.bf16 %v3557_v31  ;;  %v2484_v31 = vunpack.i.l.bf16 %v3679_v55  ;;  %v4107_v55 = vunpack.i.h.bf16 %v4097_v41  ;;  %v1758_v41 = vsel %vm1751_vm7, %v2504_v20, %v2505_v4 }
 0x4f2   : > { %2085 = vmatpush.msra.mxu1 %v4106_v34  ;;  %vm2174_vm0 = vcmask 1043456  }
 0x4f3   : > { %2129 = vmatpush.msra.mxu3 %v1866_v19  ;;  %v1792_v36 = vsel %vm1788_vm5, %v2419_v56, %v2420_v16  ;;  %v1759_v22 = vsel %vm1751_vm7, %v2505_v4, %v2484_v31  ;;  %v1828_v3 = vsel %vm1825_vm4, %v4107_v55, %v2414_v0 }
 0x4f4   : > { %2086 = vmatpush.msra.mxu1 %v1906_v6 }
 0x4f5   : > { %2130 = vmatpush.msra.mxu3 %v1833_v10 }
 0x4f6   : > { %2087 = vmatpush.msra.mxu1 %v1902_v63 }
 0x4f7   : > { %2131 = vmatpush.msra.mxu3 %v1829_v17 }
 0x4f8   : > { %2088 = vmatpush.msra.mxu1 %v1869_v35 }
 0x4f9   : > { %2132 = vmatpush.msra.mxu3 %v1796_v59 }
 0x4fa   : > { %2089 = vmatpush.msra.mxu1 %v1865_v9 }
 0x4fb   : > { %2133 = vmatpush.msra.mxu3 %v1792_v36 }
 0x4fc   : > { %2090 = vmatpush.msra.mxu1 %v1832_v12 }
 0x4fd   : > { %2134 = vmatpush.msra.mxu3 %v1759_v22 }
 0x4fe   : > { %2091 = vmatpush.msra.mxu1 %v1828_v3 }
 0x4ff   : > { %2135 = vmatpush.msra.mxu3 %v1755_v21 }
 0x500   : > { %2092 = vmatpush.msra.mxu1 %v1795_v23 }
 0x501   : > { %2136 = vmatpush.msra.mxu3 %v1722_v60 }
 0x502   : > { %2093 = vmatpush.msra.mxu1 %v1791_v40 }
 0x503   : > { %2137 = vmatpush.msra.mxu3 %v3597_v30  ;;  %v4109_v30 = vunpack.i.l.bf16 %v4093_v7 }
 0x504   : > { %2094 = vmatpush.msra.mxu1 %v1758_v41 }
 0x505   : > { %2138 = vmatpush.msra.mxu3 %v3523_v54  ;;  %v1717_v54 = vsel %vm1714_vm2, %v4109_v30, %v4108_v25 }
 0x506   : > { %2095 = vmatpush.msra.mxu1 %v1754_v39 }
 0x507   : > { %2139 = vmatpush.msra.mxu3 %v4089_v61 }
 0x508   : > { %2140 = vmatmul.f32.vlgmr.msra.gmra.mxu3 %v3773_v51  ;;  %2096 = vmatpush.msra.mxu1 %v1721_v29 }
 0x50a   : > { %2097 = vmatpush.msra.mxu1 %v1717_v54 }
 0x50c   : > { %2098 = vmatpush.msra.mxu1 %v3521_v53 }
 0x50e   : > { %2099 = vmatpush.msra.mxu1 %v4110_v15 }
 0x50f   : > { %2100 = vmatmul.f32.vlgmr.msra.gmra.mxu1 %v3773_v51 }
 0x54a   : > { %v2081_v57 = vpop.f32.mrf.mxu3 }
 0x566   : > { %v2021_v61 = vpop.f32.mrf.mxu0 }
 0x567   : > { %v2022_v11 = vadd.f32 %v2021_v61, %v1995_v52 }
 0x56a   : > { %v2121_v51 = vpop.f32.mrf.mxu3 }
 0x56c   : > { %v2041_v13 = vpop.f32.mrf.mxu1 }
 0x56d   : > { %v2042_v45 = vadd.f32 %v2041_v13, %v2022_v11 }
 0x56e   : > { %v2161_v8 = vpop.f32.mrf.mxu0 }
 0x56f   : > { %2538 = vtanh.f32 %v2042_v45 }
 0x573   : > { %v2061_v20 = vpop.f32.mrf.mxu2 }
 0x574   : > { %v2062_v46 = vadd.f32 %v2061_v20, %v1995_v52 }
 0x575   : > { %v2539_v7 = vpop.eup %2538 }
 0x576   : > { %v2082_v42 = vadd.f32 %v2081_v57, %v2062_v46 }
 0x578   : > { %2540 = vtanh.f32 %v2082_v42 }
 0x57e   : > { %v2541_v62 = vpop.eup %2540 }
 0x57f   : > { %v2172_v53 = vrot.slane %v2541_v62, 4 }
 0x581   : > { %v2175_v14 = vsel %vm2174_vm0, %v2539_v7, %v2172_v53 }
 0x582   : > { %2179 = vst [vmem:[%s413_s14] sm:$0xff] %v2175_v14 }
 0x58b   : > { %v2141_v28 = vpop.f32.mrf.mxu3 }
 0x58c   : > { %v2142_v27 = vadd.f32 %v2141_v28, %v1995_v52  ;;  %v2101_v2 = vpop.f32.mrf.mxu1 }
 0x58d   : > { %v2102_v48 = vadd.f32 %v2101_v2, %v1995_v52 }
 0x58e   : > { %v2162_v1 = vadd.f32 %v2161_v8, %v2142_v27 }
 0x58f   : > { %v2122_v47 = vadd.f32 %v2121_v51, %v2102_v48 }
 0x590   : > { %2542 = vtanh.f32 %v2162_v1 }
 0x591   : > { %2544 = vtanh.f32 %v2122_v47 }
 0x596   : > { %v2543_v37 = vpop.eup %2542 }
 0x597   : > { %v2545_v5 = vpop.eup %2544  ;;  %v2173_v33 = vrot.slane %v2543_v37, 4 }
 0x599   : > { %v2176_v18 = vsel %vm2174_vm0, %v2545_v5, %v2173_v33 }
 0x59a   : > { %2180 = vst [vmem:[%s413_s14 + $0x8] sm:$0xff] %v2176_v18 }
 0x59b PF: > { %s22_s21 = sadd.s32 1, %s2552_s21  }
 0x59c   : > { %p19_p4 = scmp.ge.s32.totalorder %s22_s21, 4  }
 0x59e   :  { %21 = sbr.rel (!%p19_p4) target bundleno = 1 (0x1), region = 99 }

</bundles_post_ra>
